<compile_context>
chip_gen: v5e
topology: v5e:2x2
jax: 0.10.0
libtpu: 0.0.40
codegen_flags: <defaults>
</compile_context>

<pallas_src>
import jax
import jax.numpy as jnp
from jax import lax
from jax.experimental import pallas as pl
from jax.experimental.pallas import tpu as pltpu


def _sigmoid(z):
    return 1.0 / (1.0 + jnp.exp(-z))


def _rel_img_rec_kernel(x_ref, mask_ref, w_ih_ref, w_hh_ref, b_ref,
                        fc_v_ref, fc_g_ref, fc_b_ref, img_ref, loss_ref):
    # x_ref    : (T, B, E)   time-major embeddings (VMEM resident)
    # mask_ref : (T, B, 1)   one-hot over time of clamp(input_len-1, 0)
    # w_ih_ref : (E, 4H)     LSTM input weights (transposed, gate order i,f,g,o)
    # w_hh_ref : (H, 4H)     LSTM recurrent weights (transposed)
    # b_ref    : (1, 4H)     b_ih + b_hh
    # fc_v_ref : (H, F)      weight_norm "v" (transposed)
    # fc_g_ref : (1, F)      weight_norm "g"
    # fc_b_ref : (1, F)      fc bias
    # img_ref  : (B, F)      reconstruction target
    # loss_ref : (1, 1)      scalar MSE loss output
    T, B, _ = x_ref.shape
    H = w_hh_ref.shape[0]
    F = fc_v_ref.shape[1]

    w_ih = w_ih_ref[...]
    w_hh = w_hh_ref[...]
    bias = b_ref[...]

    h0 = jnp.zeros((B, H), jnp.float32)
    c0 = jnp.zeros((B, H), jnp.float32)
    hsel0 = jnp.zeros((B, H), jnp.float32)

    def step(t, carry):
        h, c, h_sel = carry
        x_t = x_ref[t]                                   # (B, E)
        gates = (jnp.dot(x_t, w_ih, preferred_element_type=jnp.float32)
                 + jnp.dot(h, w_hh, preferred_element_type=jnp.float32)
                 + bias)                                 # (B, 4H)
        i_g = _sigmoid(gates[:, 0:H])
        f_g = _sigmoid(gates[:, H:2 * H])
        g_g = jnp.tanh(gates[:, 2 * H:3 * H])
        o_g = _sigmoid(gates[:, 3 * H:4 * H])
        c_new = f_g * c + i_g * g_g
        h_new = o_g * jnp.tanh(c_new)
        # accumulate the hidden state at each batch row's selected timestep
        h_sel = h_sel + mask_ref[t] * h_new              # (B,1) * (B,H)
        return h_new, c_new, h_sel

    _, _, h_sel = lax.fori_loop(0, T, step, (h0, c0, hsel0), unroll=True)

    # weight_norm (dim=0 on PyTorch (F,H) weight): per output-column of v^T
    v = fc_v_ref[...]                                            # (H, F)
    inv_norm = lax.rsqrt(jnp.sum(v * v, axis=0, keepdims=True))  # (1, F)
    w_fc = v * (fc_g_ref[...] * inv_norm)                        # (H, F)

    pred = jnp.dot(h_sel, w_fc, preferred_element_type=jnp.float32) + fc_b_ref[...]

    diff = img_ref[...] - pred                                   # (B, F)
    per_row = jnp.sum(diff * diff, axis=1, keepdims=True)        # (B, 1)
    total = jnp.sum(per_row, axis=0, keepdims=True)              # (1, 1)
    loss_ref[...] = total / float(B * F)


@jax.jit
def rel_img_rec_forward(img_feat, input_embedding, input_len,
                        w_ih, w_hh, b_ih, b_hh, fc_v, fc_g, fc_b):
    """PyTorch-layout params:
       w_ih (4H,E), w_hh (4H,H), b_ih (4H,), b_hh (4H,)
       fc_v (F,H) = weight_v, fc_g (F,1) = weight_g, fc_b (F,)"""
    B, T, E = input_embedding.shape
    H = w_hh.shape[1]
    F = fc_v.shape[0]

    # layout prep (tiny, one-time): time-major activations, transposed weights
    x_tbe = jnp.transpose(input_embedding, (1, 0, 2))            # (T, B, E)
    w_ih_t = jnp.transpose(w_ih)                                 # (E, 4H)
    w_hh_t = jnp.transpose(w_hh)                                 # (H, 4H)
    b = (b_ih + b_hh).reshape(1, 4 * H)
    fc_v_t = jnp.transpose(fc_v)                                 # (H, F)
    fc_g_2d = fc_g.reshape(1, F)
    fc_b_2d = fc_b.reshape(1, F)

    sel = jnp.maximum(input_len.astype(jnp.int32) - 1, 0)        # (B,)
    mask = (jnp.arange(T, dtype=jnp.int32)[:, None] == sel[None, :])
    mask = mask.astype(jnp.float32)[..., None]                   # (T, B, 1)

    vmem = pl.BlockSpec(memory_space=pltpu.MemorySpace.VMEM)
    loss = pl.pallas_call(
        _rel_img_rec_kernel,
        out_shape=jax.ShapeDtypeStruct((1, 1), jnp.float32),
        in_specs=[vmem] * 9,
        out_specs=vmem,
    )(x_tbe, mask, w_ih_t, w_hh_t, b, fc_v_t, fc_g_2d, fc_b_2d, img_feat)
    return loss[0, 0]


def _reference(img_feat, input_embedding, input_len,
               w_ih, w_hh, b_ih, b_hh, fc_v, fc_g, fc_b):
    B, T, E = input_embedding.shape
    H = w_hh.shape[1]

    def cell(carry, x_t):
        h, c = carry
        gates = x_t @ w_ih.T + b_ih + h @ w_hh.T + b_hh
        i = _sigmoid(gates[:, 0:H])
        f = _sigmoid(gates[:, H:2 * H])
        g = jnp.tanh(gates[:, 2 * H:3 * H])
        o = _sigmoid(gates[:, 3 * H:4 * H])
        c = f * c + i * g
        h = o * jnp.tanh(c)
        return (h, c), h

    xs = jnp.transpose(input_embedding, (1, 0, 2))               # (T, B, E)
    init = (jnp.zeros((B, H), jnp.float32), jnp.zeros((B, H), jnp.float32))
    _, hs = lax.scan(cell, init, xs)                             # (T, B, H)

    w = fc_g * fc_v / jnp.linalg.norm(fc_v, axis=1, keepdims=True)  # (F, H)
    out = hs @ w.T + fc_b                                        # (T, B, F)
    sel = jnp.maximum(input_len - 1, 0)
    pred = out[sel, jnp.arange(B), :]                            # (B, F)
    return jnp.mean((img_feat - pred) ** 2)


if __name__ == "__main__":
    # shapes implied by the module: emb_dim=16 -> embed_dim=48, decoder_dim=32,
    # feat_dim=16, batch=2, seq=8
    B, T = 2, 8
    emb_dim = 16
    E = 3 * emb_dim          # 48
    H = 32                   # decoder_dim
    F = 16                   # feat_dim

    key = jax.random.PRNGKey(0)
    ks = jax.random.split(key, 7)
    img_feat = jax.random.normal(ks[0], (B, F), dtype=jnp.float32)
    input_embedding = jax.random.normal(ks[1], (B, T, E), dtype=jnp.float32)
    input_len = jnp.array([5, 8], dtype=jnp.int32)

    s = 1.0 / jnp.sqrt(H)
    w_ih = jax.random.uniform(ks[2], (4 * H, E), jnp.float32, -s, s)
    w_hh = jax.random.uniform(ks[3], (4 * H, H), jnp.float32, -s, s)
    b_ih = jax.random.uniform(ks[4], (4 * H,), jnp.float32, -s, s)
    b_hh = jax.random.uniform(ks[5], (4 * H,), jnp.float32, -s, s)

    fc_w0 = jax.random.uniform(ks[6], (F, H), jnp.float32, -0.1, 0.1)
    fc_v = fc_w0
    fc_g = jnp.linalg.norm(fc_w0, axis=1, keepdims=True)         # (F, 1)
    fc_b = jnp.zeros((F,), dtype=jnp.float32)                    # init_weights: 0

    loss = rel_img_rec_forward(img_feat, input_embedding, input_len,
                               w_ih, w_hh, b_ih, b_hh, fc_v, fc_g, fc_b)
    loss = jax.block_until_ready(loss)

    ref = _reference(img_feat, input_embedding, input_len,
                     w_ih, w_hh, b_ih, b_hh, fc_v, fc_g, fc_b)
    assert loss.shape == (), loss.shape
    assert jnp.allclose(loss, ref, atol=1e-4, rtol=1e-4), (loss, ref)
    print("KERNEL_OK")
</pallas_src>

<mosaic_0001>
module attributes {stable_mosaic.version = 11 : i64} {
  func.func @_rel_img_rec_kernel(%arg0: memref<8x2x48xf32, #tpu.memory_space<vmem>>, %arg1: memref<8x2x1xf32, #tpu.memory_space<vmem>>, %arg2: memref<48x128xf32, #tpu.memory_space<vmem>>, %arg3: memref<32x128xf32, #tpu.memory_space<vmem>>, %arg4: memref<1x128xf32, #tpu.memory_space<vmem>>, %arg5: memref<32x16xf32, #tpu.memory_space<vmem>>, %arg6: memref<1x16xf32, #tpu.memory_space<vmem>>, %arg7: memref<1x16xf32, #tpu.memory_space<vmem>>, %arg8: memref<2x16xf32, #tpu.memory_space<vmem>>, %arg9: memref<1x1xf32, #tpu.memory_space<vmem>>) attributes {dimension_semantics = [], scalar_prefetch = 0 : i64, scratch_operands = 0 : i64, tpu.core_type = #tpu.core_type<tc>} {
    %c0 = arith.constant 0 : index
    %c0_0 = arith.constant 0 : index
    %0 = vector.load %arg2[%c0, %c0_0] : memref<48x128xf32, #tpu.memory_space<vmem>>, vector<48x128xf32>
    %c0_1 = arith.constant 0 : index
    %c0_2 = arith.constant 0 : index
    %1 = vector.load %arg3[%c0_1, %c0_2] : memref<32x128xf32, #tpu.memory_space<vmem>>, vector<32x128xf32>
    %c0_3 = arith.constant 0 : index
    %c0_4 = arith.constant 0 : index
    %2 = vector.load %arg4[%c0_3, %c0_4] : memref<1x128xf32, #tpu.memory_space<vmem>>, vector<1x128xf32>
    %cst = arith.constant 0.000000e+00 : f32
    %3 = vector.broadcast %cst : f32 to vector<2x32xf32>
    %cst_5 = arith.constant 0.000000e+00 : f32
    %4 = vector.broadcast %cst_5 : f32 to vector<2x32xf32>
    %cst_6 = arith.constant 0.000000e+00 : f32
    %5 = vector.broadcast %cst_6 : f32 to vector<2x32xf32>
    %c0_i32 = arith.constant 0 : i32
    %6 = arith.index_cast %c0_i32 : i32 to index
    %c0_7 = arith.constant 0 : index
    %c0_8 = arith.constant 0 : index
    %7 = vector.load %arg0[%6, %c0_7, %c0_8] : memref<8x2x48xf32, #tpu.memory_space<vmem>>, vector<1x2x48xf32>
    %8 = vector.shape_cast %7 : vector<1x2x48xf32> to vector<2x48xf32>
    %cst_9 = arith.constant dense<0.000000e+00> : vector<2x128xf32>
    %9 = tpu.matmul %8, %0, %cst_9 {dimension_numbers = #tpu.dot_dimension_numbers<[1], [0], [0], [1], [0, 0, 1, 1], [], []>} : vector<2x48xf32>, vector<48x128xf32>, vector<2x128xf32> -> vector<2x128xf32>
    %cst_10 = arith.constant dense<0.000000e+00> : vector<2x128xf32>
    %10 = tpu.matmul %3, %1, %cst_10 {dimension_numbers = #tpu.dot_dimension_numbers<[1], [0], [0], [1], [0, 0, 1, 1], [], []>} : vector<2x32xf32>, vector<32x128xf32>, vector<2x128xf32> -> vector<2x128xf32>
    %11 = arith.addf %9, %10 : vector<2x128xf32>
    %12 = vector.broadcast %2 : vector<1x128xf32> to vector<2x128xf32>
    %13 = arith.addf %11, %12 : vector<2x128xf32>
    %14 = vector.extract_strided_slice %13 {offsets = [0, 0], sizes = [2, 32], strides = [1, 1]} : vector<2x128xf32> to vector<2x32xf32>
    %cst_11 = arith.constant 0.000000e+00 : f32
    %15 = vector.broadcast %cst_11 : f32 to vector<2x32xf32>
    %16 = arith.subf %15, %14 : vector<2x32xf32>
    %17 = math.exp %16 : vector<2x32xf32>
    %cst_12 = arith.constant 1.000000e+00 : f32
    %18 = vector.broadcast %cst_12 : f32 to vector<2x32xf32>
    %19 = arith.addf %18, %17 : vector<2x32xf32>
    %cst_13 = arith.constant 1.000000e+00 : f32
    %20 = vector.broadcast %cst_13 : f32 to vector<2x32xf32>
    %21 = arith.divf %20, %19 : vector<2x32xf32>
    %22 = vector.extract_strided_slice %13 {offsets = [0, 32], sizes = [2, 32], strides = [1, 1]} : vector<2x128xf32> to vector<2x32xf32>
    %cst_14 = arith.constant 0.000000e+00 : f32
    %23 = vector.broadcast %cst_14 : f32 to vector<2x32xf32>
    %24 = arith.subf %23, %22 : vector<2x32xf32>
    %25 = math.exp %24 : vector<2x32xf32>
    %cst_15 = arith.constant 1.000000e+00 : f32
    %26 = vector.broadcast %cst_15 : f32 to vector<2x32xf32>
    %27 = arith.addf %26, %25 : vector<2x32xf32>
    %cst_16 = arith.constant 1.000000e+00 : f32
    %28 = vector.broadcast %cst_16 : f32 to vector<2x32xf32>
    %29 = arith.divf %28, %27 : vector<2x32xf32>
    %30 = vector.extract_strided_slice %13 {offsets = [0, 64], sizes = [2, 32], strides = [1, 1]} : vector<2x128xf32> to vector<2x32xf32>
    %31 = math.tanh %30 : vector<2x32xf32>
    %32 = vector.extract_strided_slice %13 {offsets = [0, 96], sizes = [2, 32], strides = [1, 1]} : vector<2x128xf32> to vector<2x32xf32>
    %cst_17 = arith.constant 0.000000e+00 : f32
    %33 = vector.broadcast %cst_17 : f32 to vector<2x32xf32>
    %34 = arith.subf %33, %32 : vector<2x32xf32>
    %35 = math.exp %34 : vector<2x32xf32>
    %cst_18 = arith.constant 1.000000e+00 : f32
    %36 = vector.broadcast %cst_18 : f32 to vector<2x32xf32>
    %37 = arith.addf %36, %35 : vector<2x32xf32>
    %cst_19 = arith.constant 1.000000e+00 : f32
    %38 = vector.broadcast %cst_19 : f32 to vector<2x32xf32>
    %39 = arith.divf %38, %37 : vector<2x32xf32>
    %40 = arith.mulf %29, %4 : vector<2x32xf32>
    %41 = arith.mulf %21, %31 : vector<2x32xf32>
    %42 = arith.addf %40, %41 : vector<2x32xf32>
    %43 = math.tanh %42 : vector<2x32xf32>
    %44 = arith.mulf %39, %43 : vector<2x32xf32>
    %45 = arith.index_cast %c0_i32 : i32 to index
    %c0_20 = arith.constant 0 : index
    %c0_21 = arith.constant 0 : index
    %46 = vector.load %arg1[%45, %c0_20, %c0_21] : memref<8x2x1xf32, #tpu.memory_space<vmem>>, vector<1x2x1xf32>
    %47 = vector.shape_cast %46 : vector<1x2x1xf32> to vector<2x1xf32>
    %48 = vector.broadcast %47 : vector<2x1xf32> to vector<2x32xf32>
    %49 = arith.mulf %48, %44 : vector<2x32xf32>
    %50 = arith.addf %5, %49 : vector<2x32xf32>
    %c1_i32 = arith.constant 1 : i32
    %51 = arith.index_cast %c1_i32 : i32 to index
    %c0_22 = arith.constant 0 : index
    %c0_23 = arith.constant 0 : index
    %52 = vector.load %arg0[%51, %c0_22, %c0_23] : memref<8x2x48xf32, #tpu.memory_space<vmem>>, vector<1x2x48xf32>
    %53 = vector.shape_cast %52 : vector<1x2x48xf32> to vector<2x48xf32>
    %cst_24 = arith.constant dense<0.000000e+00> : vector<2x128xf32>
    %54 = tpu.matmul %53, %0, %cst_24 {dimension_numbers = #tpu.dot_dimension_numbers<[1], [0], [0], [1], [0, 0, 1, 1], [], []>} : vector<2x48xf32>, vector<48x128xf32>, vector<2x128xf32> -> vector<2x128xf32>
    %cst_25 = arith.constant dense<0.000000e+00> : vector<2x128xf32>
    %55 = tpu.matmul %44, %1, %cst_25 {dimension_numbers = #tpu.dot_dimension_numbers<[1], [0], [0], [1], [0, 0, 1, 1], [], []>} : vector<2x32xf32>, vector<32x128xf32>, vector<2x128xf32> -> vector<2x128xf32>
    %56 = arith.addf %54, %55 : vector<2x128xf32>
    %57 = vector.broadcast %2 : vector<1x128xf32> to vector<2x128xf32>
    %58 = arith.addf %56, %57 : vector<2x128xf32>
    %59 = vector.extract_strided_slice %58 {offsets = [0, 0], sizes = [2, 32], strides = [1, 1]} : vector<2x128xf32> to vector<2x32xf32>
    %cst_26 = arith.constant 0.000000e+00 : f32
    %60 = vector.broadcast %cst_26 : f32 to vector<2x32xf32>
    %61 = arith.subf %60, %59 : vector<2x32xf32>
    %62 = math.exp %61 : vector<2x32xf32>
    %cst_27 = arith.constant 1.000000e+00 : f32
    %63 = vector.broadcast %cst_27 : f32 to vector<2x32xf32>
    %64 = arith.addf %63, %62 : vector<2x32xf32>
    %cst_28 = arith.constant 1.000000e+00 : f32
    %65 = vector.broadcast %cst_28 : f32 to vector<2x32xf32>
    %66 = arith.divf %65, %64 : vector<2x32xf32>
    %67 = vector.extract_strided_slice %58 {offsets = [0, 32], sizes = [2, 32], strides = [1, 1]} : vector<2x128xf32> to vector<2x32xf32>
    %cst_29 = arith.constant 0.000000e+00 : f32
    %68 = vector.broadcast %cst_29 : f32 to vector<2x32xf32>
    %69 = arith.subf %68, %67 : vector<2x32xf32>
    %70 = math.exp %69 : vector<2x32xf32>
    %cst_30 = arith.constant 1.000000e+00 : f32
    %71 = vector.broadcast %cst_30 : f32 to vector<2x32xf32>
    %72 = arith.addf %71, %70 : vector<2x32xf32>
    %cst_31 = arith.constant 1.000000e+00 : f32
    %73 = vector.broadcast %cst_31 : f32 to vector<2x32xf32>
    %74 = arith.divf %73, %72 : vector<2x32xf32>
    %75 = vector.extract_strided_slice %58 {offsets = [0, 64], sizes = [2, 32], strides = [1, 1]} : vector<2x128xf32> to vector<2x32xf32>
    %76 = math.tanh %75 : vector<2x32xf32>
    %77 = vector.extract_strided_slice %58 {offsets = [0, 96], sizes = [2, 32], strides = [1, 1]} : vector<2x128xf32> to vector<2x32xf32>
    %cst_32 = arith.constant 0.000000e+00 : f32
    %78 = vector.broadcast %cst_32 : f32 to vector<2x32xf32>
    %79 = arith.subf %78, %77 : vector<2x32xf32>
    %80 = math.exp %79 : vector<2x32xf32>
    %cst_33 = arith.constant 1.000000e+00 : f32
    %81 = vector.broadcast %cst_33 : f32 to vector<2x32xf32>
    %82 = arith.addf %81, %80 : vector<2x32xf32>
    %cst_34 = arith.constant 1.000000e+00 : f32
    %83 = vector.broadcast %cst_34 : f32 to vector<2x32xf32>
    %84 = arith.divf %83, %82 : vector<2x32xf32>
    %85 = arith.mulf %74, %42 : vector<2x32xf32>
    %86 = arith.mulf %66, %76 : vector<2x32xf32>
    %87 = arith.addf %85, %86 : vector<2x32xf32>
    %88 = math.tanh %87 : vector<2x32xf32>
    %89 = arith.mulf %84, %88 : vector<2x32xf32>
    %90 = arith.index_cast %c1_i32 : i32 to index
    %c0_35 = arith.constant 0 : index
    %c0_36 = arith.constant 0 : index
    %91 = vector.load %arg1[%90, %c0_35, %c0_36] : memref<8x2x1xf32, #tpu.memory_space<vmem>>, vector<1x2x1xf32>
    %92 = vector.shape_cast %91 : vector<1x2x1xf32> to vector<2x1xf32>
    %93 = vector.broadcast %92 : vector<2x1xf32> to vector<2x32xf32>
    %94 = arith.mulf %93, %89 : vector<2x32xf32>
    %95 = arith.addf %50, %94 : vector<2x32xf32>
    %c2_i32 = arith.constant 2 : i32
    %96 = arith.index_cast %c2_i32 : i32 to index
    %c0_37 = arith.constant 0 : index
    %c0_38 = arith.constant 0 : index
    %97 = vector.load %arg0[%96, %c0_37, %c0_38] : memref<8x2x48xf32, #tpu.memory_space<vmem>>, vector<1x2x48xf32>
    %98 = vector.shape_cast %97 : vector<1x2x48xf32> to vector<2x48xf32>
    %cst_39 = arith.constant dense<0.000000e+00> : vector<2x128xf32>
    %99 = tpu.matmul %98, %0, %cst_39 {dimension_numbers = #tpu.dot_dimension_numbers<[1], [0], [0], [1], [0, 0, 1, 1], [], []>} : vector<2x48xf32>, vector<48x128xf32>, vector<2x128xf32> -> vector<2x128xf32>
    %cst_40 = arith.constant dense<0.000000e+00> : vector<2x128xf32>
    %100 = tpu.matmul %89, %1, %cst_40 {dimension_numbers = #tpu.dot_dimension_numbers<[1], [0], [0], [1], [0, 0, 1, 1], [], []>} : vector<2x32xf32>, vector<32x128xf32>, vector<2x128xf32> -> vector<2x128xf32>
    %101 = arith.addf %99, %100 : vector<2x128xf32>
    %102 = vector.broadcast %2 : vector<1x128xf32> to vector<2x128xf32>
    %103 = arith.addf %101, %102 : vector<2x128xf32>
    %104 = vector.extract_strided_slice %103 {offsets = [0, 0], sizes = [2, 32], strides = [1, 1]} : vector<2x128xf32> to vector<2x32xf32>
    %cst_41 = arith.constant 0.000000e+00 : f32
    %105 = vector.broadcast %cst_41 : f32 to vector<2x32xf32>
    %106 = arith.subf %105, %104 : vector<2x32xf32>
    %107 = math.exp %106 : vector<2x32xf32>
    %cst_42 = arith.constant 1.000000e+00 : f32
    %108 = vector.broadcast %cst_42 : f32 to vector<2x32xf32>
    %109 = arith.addf %108, %107 : vector<2x32xf32>
    %cst_43 = arith.constant 1.000000e+00 : f32
    %110 = vector.broadcast %cst_43 : f32 to vector<2x32xf32>
    %111 = arith.divf %110, %109 : vector<2x32xf32>
    %112 = vector.extract_strided_slice %103 {offsets = [0, 32], sizes = [2, 32], strides = [1, 1]} : vector<2x128xf32> to vector<2x32xf32>
    %cst_44 = arith.constant 0.000000e+00 : f32
    %113 = vector.broadcast %cst_44 : f32 to vector<2x32xf32>
    %114 = arith.subf %113, %112 : vector<2x32xf32>
    %115 = math.exp %114 : vector<2x32xf32>
    %cst_45 = arith.constant 1.000000e+00 : f32
    %116 = vector.broadcast %cst_45 : f32 to vector<2x32xf32>
    %117 = arith.addf %116, %115 : vector<2x32xf32>
    %cst_46 = arith.constant 1.000000e+00 : f32
    %118 = vector.broadcast %cst_46 : f32 to vector<2x32xf32>
    %119 = arith.divf %118, %117 : vector<2x32xf32>
    %120 = vector.extract_strided_slice %103 {offsets = [0, 64], sizes = [2, 32], strides = [1, 1]} : vector<2x128xf32> to vector<2x32xf32>
    %121 = math.tanh %120 : vector<2x32xf32>
    %122 = vector.extract_strided_slice %103 {offsets = [0, 96], sizes = [2, 32], strides = [1, 1]} : vector<2x128xf32> to vector<2x32xf32>
    %cst_47 = arith.constant 0.000000e+00 : f32
    %123 = vector.broadcast %cst_47 : f32 to vector<2x32xf32>
    %124 = arith.subf %123, %122 : vector<2x32xf32>
    %125 = math.exp %124 : vector<2x32xf32>
    %cst_48 = arith.constant 1.000000e+00 : f32
    %126 = vector.broadcast %cst_48 : f32 to vector<2x32xf32>
    %127 = arith.addf %126, %125 : vector<2x32xf32>
    %cst_49 = arith.constant 1.000000e+00 : f32
    %128 = vector.broadcast %cst_49 : f32 to vector<2x32xf32>
    %129 = arith.divf %128, %127 : vector<2x32xf32>
    %130 = arith.mulf %119, %87 : vector<2x32xf32>
    %131 = arith.mulf %111, %121 : vector<2x32xf32>
    %132 = arith.addf %130, %131 : vector<2x32xf32>
    %133 = math.tanh %132 : vector<2x32xf32>
    %134 = arith.mulf %129, %133 : vector<2x32xf32>
    %135 = arith.index_cast %c2_i32 : i32 to index
    %c0_50 = arith.constant 0 : index
    %c0_51 = arith.constant 0 : index
    %136 = vector.load %arg1[%135, %c0_50, %c0_51] : memref<8x2x1xf32, #tpu.memory_space<vmem>>, vector<1x2x1xf32>
    %137 = vector.shape_cast %136 : vector<1x2x1xf32> to vector<2x1xf32>
    %138 = vector.broadcast %137 : vector<2x1xf32> to vector<2x32xf32>
    %139 = arith.mulf %138, %134 : vector<2x32xf32>
    %140 = arith.addf %95, %139 : vector<2x32xf32>
    %c3_i32 = arith.constant 3 : i32
    %141 = arith.index_cast %c3_i32 : i32 to index
    %c0_52 = arith.constant 0 : index
    %c0_53 = arith.constant 0 : index
    %142 = vector.load %arg0[%141, %c0_52, %c0_53] : memref<8x2x48xf32, #tpu.memory_space<vmem>>, vector<1x2x48xf32>
    %143 = vector.shape_cast %142 : vector<1x2x48xf32> to vector<2x48xf32>
    %cst_54 = arith.constant dense<0.000000e+00> : vector<2x128xf32>
    %144 = tpu.matmul %143, %0, %cst_54 {dimension_numbers = #tpu.dot_dimension_numbers<[1], [0], [0], [1], [0, 0, 1, 1], [], []>} : vector<2x48xf32>, vector<48x128xf32>, vector<2x128xf32> -> vector<2x128xf32>
    %cst_55 = arith.constant dense<0.000000e+00> : vector<2x128xf32>
    %145 = tpu.matmul %134, %1, %cst_55 {dimension_numbers = #tpu.dot_dimension_numbers<[1], [0], [0], [1], [0, 0, 1, 1], [], []>} : vector<2x32xf32>, vector<32x128xf32>, vector<2x128xf32> -> vector<2x128xf32>
    %146 = arith.addf %144, %145 : vector<2x128xf32>
    %147 = vector.broadcast %2 : vector<1x128xf32> to vector<2x128xf32>
    %148 = arith.addf %146, %147 : vector<2x128xf32>
    %149 = vector.extract_strided_slice %148 {offsets = [0, 0], sizes = [2, 32], strides = [1, 1]} : vector<2x128xf32> to vector<2x32xf32>
    %cst_56 = arith.constant 0.000000e+00 : f32
    %150 = vector.broadcast %cst_56 : f32 to vector<2x32xf32>
    %151 = arith.subf %150, %149 : vector<2x32xf32>
    %152 = math.exp %151 : vector<2x32xf32>
    %cst_57 = arith.constant 1.000000e+00 : f32
    %153 = vector.broadcast %cst_57 : f32 to vector<2x32xf32>
    %154 = arith.addf %153, %152 : vector<2x32xf32>
    %cst_58 = arith.constant 1.000000e+00 : f32
    %155 = vector.broadcast %cst_58 : f32 to vector<2x32xf32>
    %156 = arith.divf %155, %154 : vector<2x32xf32>
    %157 = vector.extract_strided_slice %148 {offsets = [0, 32], sizes = [2, 32], strides = [1, 1]} : vector<2x128xf32> to vector<2x32xf32>
    %cst_59 = arith.constant 0.000000e+00 : f32
    %158 = vector.broadcast %cst_59 : f32 to vector<2x32xf32>
    %159 = arith.subf %158, %157 : vector<2x32xf32>
    %160 = math.exp %159 : vector<2x32xf32>
    %cst_60 = arith.constant 1.000000e+00 : f32
    %161 = vector.broadcast %cst_60 : f32 to vector<2x32xf32>
    %162 = arith.addf %161, %160 : vector<2x32xf32>
    %cst_61 = arith.constant 1.000000e+00 : f32
    %163 = vector.broadcast %cst_61 : f32 to vector<2x32xf32>
    %164 = arith.divf %163, %162 : vector<2x32xf32>
    %165 = vector.extract_strided_slice %148 {offsets = [0, 64], sizes = [2, 32], strides = [1, 1]} : vector<2x128xf32> to vector<2x32xf32>
    %166 = math.tanh %165 : vector<2x32xf32>
    %167 = vector.extract_strided_slice %148 {offsets = [0, 96], sizes = [2, 32], strides = [1, 1]} : vector<2x128xf32> to vector<2x32xf32>
    %cst_62 = arith.constant 0.000000e+00 : f32
    %168 = vector.broadcast %cst_62 : f32 to vector<2x32xf32>
    %169 = arith.subf %168, %167 : vector<2x32xf32>
    %170 = math.exp %169 : vector<2x32xf32>
    %cst_63 = arith.constant 1.000000e+00 : f32
    %171 = vector.broadcast %cst_63 : f32 to vector<2x32xf32>
    %172 = arith.addf %171, %170 : vector<2x32xf32>
    %cst_64 = arith.constant 1.000000e+00 : f32
    %173 = vector.broadcast %cst_64 : f32 to vector<2x32xf32>
    %174 = arith.divf %173, %172 : vector<2x32xf32>
    %175 = arith.mulf %164, %132 : vector<2x32xf32>
    %176 = arith.mulf %156, %166 : vector<2x32xf32>
    %177 = arith.addf %175, %176 : vector<2x32xf32>
    %178 = math.tanh %177 : vector<2x32xf32>
    %179 = arith.mulf %174, %178 : vector<2x32xf32>
    %180 = arith.index_cast %c3_i32 : i32 to index
    %c0_65 = arith.constant 0 : index
    %c0_66 = arith.constant 0 : index
    %181 = vector.load %arg1[%180, %c0_65, %c0_66] : memref<8x2x1xf32, #tpu.memory_space<vmem>>, vector<1x2x1xf32>
    %182 = vector.shape_cast %181 : vector<1x2x1xf32> to vector<2x1xf32>
    %183 = vector.broadcast %182 : vector<2x1xf32> to vector<2x32xf32>
    %184 = arith.mulf %183, %179 : vector<2x32xf32>
    %185 = arith.addf %140, %184 : vector<2x32xf32>
    %c4_i32 = arith.constant 4 : i32
    %186 = arith.index_cast %c4_i32 : i32 to index
    %c0_67 = arith.constant 0 : index
    %c0_68 = arith.constant 0 : index
    %187 = vector.load %arg0[%186, %c0_67, %c0_68] : memref<8x2x48xf32, #tpu.memory_space<vmem>>, vector<1x2x48xf32>
    %188 = vector.shape_cast %187 : vector<1x2x48xf32> to vector<2x48xf32>
    %cst_69 = arith.constant dense<0.000000e+00> : vector<2x128xf32>
    %189 = tpu.matmul %188, %0, %cst_69 {dimension_numbers = #tpu.dot_dimension_numbers<[1], [0], [0], [1], [0, 0, 1, 1], [], []>} : vector<2x48xf32>, vector<48x128xf32>, vector<2x128xf32> -> vector<2x128xf32>
    %cst_70 = arith.constant dense<0.000000e+00> : vector<2x128xf32>
    %190 = tpu.matmul %179, %1, %cst_70 {dimension_numbers = #tpu.dot_dimension_numbers<[1], [0], [0], [1], [0, 0, 1, 1], [], []>} : vector<2x32xf32>, vector<32x128xf32>, vector<2x128xf32> -> vector<2x128xf32>
    %191 = arith.addf %189, %190 : vector<2x128xf32>
    %192 = vector.broadcast %2 : vector<1x128xf32> to vector<2x128xf32>
    %193 = arith.addf %191, %192 : vector<2x128xf32>
    %194 = vector.extract_strided_slice %193 {offsets = [0, 0], sizes = [2, 32], strides = [1, 1]} : vector<2x128xf32> to vector<2x32xf32>
    %cst_71 = arith.constant 0.000000e+00 : f32
    %195 = vector.broadcast %cst_71 : f32 to vector<2x32xf32>
    %196 = arith.subf %195, %194 : vector<2x32xf32>
    %197 = math.exp %196 : vector<2x32xf32>
    %cst_72 = arith.constant 1.000000e+00 : f32
    %198 = vector.broadcast %cst_72 : f32 to vector<2x32xf32>
    %199 = arith.addf %198, %197 : vector<2x32xf32>
    %cst_73 = arith.constant 1.000000e+00 : f32
    %200 = vector.broadcast %cst_73 : f32 to vector<2x32xf32>
    %201 = arith.divf %200, %199 : vector<2x32xf32>
    %202 = vector.extract_strided_slice %193 {offsets = [0, 32], sizes = [2, 32], strides = [1, 1]} : vector<2x128xf32> to vector<2x32xf32>
    %cst_74 = arith.constant 0.000000e+00 : f32
    %203 = vector.broadcast %cst_74 : f32 to vector<2x32xf32>
    %204 = arith.subf %203, %202 : vector<2x32xf32>
    %205 = math.exp %204 : vector<2x32xf32>
    %cst_75 = arith.constant 1.000000e+00 : f32
    %206 = vector.broadcast %cst_75 : f32 to vector<2x32xf32>
    %207 = arith.addf %206, %205 : vector<2x32xf32>
    %cst_76 = arith.constant 1.000000e+00 : f32
    %208 = vector.broadcast %cst_76 : f32 to vector<2x32xf32>
    %209 = arith.divf %208, %207 : vector<2x32xf32>
    %210 = vector.extract_strided_slice %193 {offsets = [0, 64], sizes = [2, 32], strides = [1, 1]} : vector<2x128xf32> to vector<2x32xf32>
    %211 = math.tanh %210 : vector<2x32xf32>
    %212 = vector.extract_strided_slice %193 {offsets = [0, 96], sizes = [2, 32], strides = [1, 1]} : vector<2x128xf32> to vector<2x32xf32>
    %cst_77 = arith.constant 0.000000e+00 : f32
    %213 = vector.broadcast %cst_77 : f32 to vector<2x32xf32>
    %214 = arith.subf %213, %212 : vector<2x32xf32>
    %215 = math.exp %214 : vector<2x32xf32>
    %cst_78 = arith.constant 1.000000e+00 : f32
    %216 = vector.broadcast %cst_78 : f32 to vector<2x32xf32>
    %217 = arith.addf %216, %215 : vector<2x32xf32>
    %cst_79 = arith.constant 1.000000e+00 : f32
    %218 = vector.broadcast %cst_79 : f32 to vector<2x32xf32>
    %219 = arith.divf %218, %217 : vector<2x32xf32>
    %220 = arith.mulf %209, %177 : vector<2x32xf32>
    %221 = arith.mulf %201, %211 : vector<2x32xf32>
    %222 = arith.addf %220, %221 : vector<2x32xf32>
    %223 = math.tanh %222 : vector<2x32xf32>
    %224 = arith.mulf %219, %223 : vector<2x32xf32>
    %225 = arith.index_cast %c4_i32 : i32 to index
    %c0_80 = arith.constant 0 : index
    %c0_81 = arith.constant 0 : index
    %226 = vector.load %arg1[%225, %c0_80, %c0_81] : memref<8x2x1xf32, #tpu.memory_space<vmem>>, vector<1x2x1xf32>
    %227 = vector.shape_cast %226 : vector<1x2x1xf32> to vector<2x1xf32>
    %228 = vector.broadcast %227 : vector<2x1xf32> to vector<2x32xf32>
    %229 = arith.mulf %228, %224 : vector<2x32xf32>
    %230 = arith.addf %185, %229 : vector<2x32xf32>
    %c5_i32 = arith.constant 5 : i32
    %231 = arith.index_cast %c5_i32 : i32 to index
    %c0_82 = arith.constant 0 : index
    %c0_83 = arith.constant 0 : index
    %232 = vector.load %arg0[%231, %c0_82, %c0_83] : memref<8x2x48xf32, #tpu.memory_space<vmem>>, vector<1x2x48xf32>
    %233 = vector.shape_cast %232 : vector<1x2x48xf32> to vector<2x48xf32>
    %cst_84 = arith.constant dense<0.000000e+00> : vector<2x128xf32>
    %234 = tpu.matmul %233, %0, %cst_84 {dimension_numbers = #tpu.dot_dimension_numbers<[1], [0], [0], [1], [0, 0, 1, 1], [], []>} : vector<2x48xf32>, vector<48x128xf32>, vector<2x128xf32> -> vector<2x128xf32>
    %cst_85 = arith.constant dense<0.000000e+00> : vector<2x128xf32>
    %235 = tpu.matmul %224, %1, %cst_85 {dimension_numbers = #tpu.dot_dimension_numbers<[1], [0], [0], [1], [0, 0, 1, 1], [], []>} : vector<2x32xf32>, vector<32x128xf32>, vector<2x128xf32> -> vector<2x128xf32>
    %236 = arith.addf %234, %235 : vector<2x128xf32>
    %237 = vector.broadcast %2 : vector<1x128xf32> to vector<2x128xf32>
    %238 = arith.addf %236, %237 : vector<2x128xf32>
    %239 = vector.extract_strided_slice %238 {offsets = [0, 0], sizes = [2, 32], strides = [1, 1]} : vector<2x128xf32> to vector<2x32xf32>
    %cst_86 = arith.constant 0.000000e+00 : f32
    %240 = vector.broadcast %cst_86 : f32 to vector<2x32xf32>
    %241 = arith.subf %240, %239 : vector<2x32xf32>
    %242 = math.exp %241 : vector<2x32xf32>
    %cst_87 = arith.constant 1.000000e+00 : f32
    %243 = vector.broadcast %cst_87 : f32 to vector<2x32xf32>
    %244 = arith.addf %243, %242 : vector<2x32xf32>
    %cst_88 = arith.constant 1.000000e+00 : f32
    %245 = vector.broadcast %cst_88 : f32 to vector<2x32xf32>
    %246 = arith.divf %245, %244 : vector<2x32xf32>
    %247 = vector.extract_strided_slice %238 {offsets = [0, 32], sizes = [2, 32], strides = [1, 1]} : vector<2x128xf32> to vector<2x32xf32>
    %cst_89 = arith.constant 0.000000e+00 : f32
    %248 = vector.broadcast %cst_89 : f32 to vector<2x32xf32>
    %249 = arith.subf %248, %247 : vector<2x32xf32>
    %250 = math.exp %249 : vector<2x32xf32>
    %cst_90 = arith.constant 1.000000e+00 : f32
    %251 = vector.broadcast %cst_90 : f32 to vector<2x32xf32>
    %252 = arith.addf %251, %250 : vector<2x32xf32>
    %cst_91 = arith.constant 1.000000e+00 : f32
    %253 = vector.broadcast %cst_91 : f32 to vector<2x32xf32>
    %254 = arith.divf %253, %252 : vector<2x32xf32>
    %255 = vector.extract_strided_slice %238 {offsets = [0, 64], sizes = [2, 32], strides = [1, 1]} : vector<2x128xf32> to vector<2x32xf32>
    %256 = math.tanh %255 : vector<2x32xf32>
    %257 = vector.extract_strided_slice %238 {offsets = [0, 96], sizes = [2, 32], strides = [1, 1]} : vector<2x128xf32> to vector<2x32xf32>
    %cst_92 = arith.constant 0.000000e+00 : f32
    %258 = vector.broadcast %cst_92 : f32 to vector<2x32xf32>
    %259 = arith.subf %258, %257 : vector<2x32xf32>
    %260 = math.exp %259 : vector<2x32xf32>
    %cst_93 = arith.constant 1.000000e+00 : f32
    %261 = vector.broadcast %cst_93 : f32 to vector<2x32xf32>
    %262 = arith.addf %261, %260 : vector<2x32xf32>
    %cst_94 = arith.constant 1.000000e+00 : f32
    %263 = vector.broadcast %cst_94 : f32 to vector<2x32xf32>
    %264 = arith.divf %263, %262 : vector<2x32xf32>
    %265 = arith.mulf %254, %222 : vector<2x32xf32>
    %266 = arith.mulf %246, %256 : vector<2x32xf32>
    %267 = arith.addf %265, %266 : vector<2x32xf32>
    %268 = math.tanh %267 : vector<2x32xf32>
    %269 = arith.mulf %264, %268 : vector<2x32xf32>
    %270 = arith.index_cast %c5_i32 : i32 to index
    %c0_95 = arith.constant 0 : index
    %c0_96 = arith.constant 0 : index
    %271 = vector.load %arg1[%270, %c0_95, %c0_96] : memref<8x2x1xf32, #tpu.memory_space<vmem>>, vector<1x2x1xf32>
    %272 = vector.shape_cast %271 : vector<1x2x1xf32> to vector<2x1xf32>
    %273 = vector.broadcast %272 : vector<2x1xf32> to vector<2x32xf32>
    %274 = arith.mulf %273, %269 : vector<2x32xf32>
    %275 = arith.addf %230, %274 : vector<2x32xf32>
    %c6_i32 = arith.constant 6 : i32
    %276 = arith.index_cast %c6_i32 : i32 to index
    %c0_97 = arith.constant 0 : index
    %c0_98 = arith.constant 0 : index
    %277 = vector.load %arg0[%276, %c0_97, %c0_98] : memref<8x2x48xf32, #tpu.memory_space<vmem>>, vector<1x2x48xf32>
    %278 = vector.shape_cast %277 : vector<1x2x48xf32> to vector<2x48xf32>
    %cst_99 = arith.constant dense<0.000000e+00> : vector<2x128xf32>
    %279 = tpu.matmul %278, %0, %cst_99 {dimension_numbers = #tpu.dot_dimension_numbers<[1], [0], [0], [1], [0, 0, 1, 1], [], []>} : vector<2x48xf32>, vector<48x128xf32>, vector<2x128xf32> -> vector<2x128xf32>
    %cst_100 = arith.constant dense<0.000000e+00> : vector<2x128xf32>
    %280 = tpu.matmul %269, %1, %cst_100 {dimension_numbers = #tpu.dot_dimension_numbers<[1], [0], [0], [1], [0, 0, 1, 1], [], []>} : vector<2x32xf32>, vector<32x128xf32>, vector<2x128xf32> -> vector<2x128xf32>
    %281 = arith.addf %279, %280 : vector<2x128xf32>
    %282 = vector.broadcast %2 : vector<1x128xf32> to vector<2x128xf32>
    %283 = arith.addf %281, %282 : vector<2x128xf32>
    %284 = vector.extract_strided_slice %283 {offsets = [0, 0], sizes = [2, 32], strides = [1, 1]} : vector<2x128xf32> to vector<2x32xf32>
    %cst_101 = arith.constant 0.000000e+00 : f32
    %285 = vector.broadcast %cst_101 : f32 to vector<2x32xf32>
    %286 = arith.subf %285, %284 : vector<2x32xf32>
    %287 = math.exp %286 : vector<2x32xf32>
    %cst_102 = arith.constant 1.000000e+00 : f32
    %288 = vector.broadcast %cst_102 : f32 to vector<2x32xf32>
    %289 = arith.addf %288, %287 : vector<2x32xf32>
    %cst_103 = arith.constant 1.000000e+00 : f32
    %290 = vector.broadcast %cst_103 : f32 to vector<2x32xf32>
    %291 = arith.divf %290, %289 : vector<2x32xf32>
    %292 = vector.extract_strided_slice %283 {offsets = [0, 32], sizes = [2, 32], strides = [1, 1]} : vector<2x128xf32> to vector<2x32xf32>
    %cst_104 = arith.constant 0.000000e+00 : f32
    %293 = vector.broadcast %cst_104 : f32 to vector<2x32xf32>
    %294 = arith.subf %293, %292 : vector<2x32xf32>
    %295 = math.exp %294 : vector<2x32xf32>
    %cst_105 = arith.constant 1.000000e+00 : f32
    %296 = vector.broadcast %cst_105 : f32 to vector<2x32xf32>
    %297 = arith.addf %296, %295 : vector<2x32xf32>
    %cst_106 = arith.constant 1.000000e+00 : f32
    %298 = vector.broadcast %cst_106 : f32 to vector<2x32xf32>
    %299 = arith.divf %298, %297 : vector<2x32xf32>
    %300 = vector.extract_strided_slice %283 {offsets = [0, 64], sizes = [2, 32], strides = [1, 1]} : vector<2x128xf32> to vector<2x32xf32>
    %301 = math.tanh %300 : vector<2x32xf32>
    %302 = vector.extract_strided_slice %283 {offsets = [0, 96], sizes = [2, 32], strides = [1, 1]} : vector<2x128xf32> to vector<2x32xf32>
    %cst_107 = arith.constant 0.000000e+00 : f32
    %303 = vector.broadcast %cst_107 : f32 to vector<2x32xf32>
    %304 = arith.subf %303, %302 : vector<2x32xf32>
    %305 = math.exp %304 : vector<2x32xf32>
    %cst_108 = arith.constant 1.000000e+00 : f32
    %306 = vector.broadcast %cst_108 : f32 to vector<2x32xf32>
    %307 = arith.addf %306, %305 : vector<2x32xf32>
    %cst_109 = arith.constant 1.000000e+00 : f32
    %308 = vector.broadcast %cst_109 : f32 to vector<2x32xf32>
    %309 = arith.divf %308, %307 : vector<2x32xf32>
    %310 = arith.mulf %299, %267 : vector<2x32xf32>
    %311 = arith.mulf %291, %301 : vector<2x32xf32>
    %312 = arith.addf %310, %311 : vector<2x32xf32>
    %313 = math.tanh %312 : vector<2x32xf32>
    %314 = arith.mulf %309, %313 : vector<2x32xf32>
    %315 = arith.index_cast %c6_i32 : i32 to index
    %c0_110 = arith.constant 0 : index
    %c0_111 = arith.constant 0 : index
    %316 = vector.load %arg1[%315, %c0_110, %c0_111] : memref<8x2x1xf32, #tpu.memory_space<vmem>>, vector<1x2x1xf32>
    %317 = vector.shape_cast %316 : vector<1x2x1xf32> to vector<2x1xf32>
    %318 = vector.broadcast %317 : vector<2x1xf32> to vector<2x32xf32>
    %319 = arith.mulf %318, %314 : vector<2x32xf32>
    %320 = arith.addf %275, %319 : vector<2x32xf32>
    %c7_i32 = arith.constant 7 : i32
    %321 = arith.index_cast %c7_i32 : i32 to index
    %c0_112 = arith.constant 0 : index
    %c0_113 = arith.constant 0 : index
    %322 = vector.load %arg0[%321, %c0_112, %c0_113] : memref<8x2x48xf32, #tpu.memory_space<vmem>>, vector<1x2x48xf32>
    %323 = vector.shape_cast %322 : vector<1x2x48xf32> to vector<2x48xf32>
    %cst_114 = arith.constant dense<0.000000e+00> : vector<2x128xf32>
    %324 = tpu.matmul %323, %0, %cst_114 {dimension_numbers = #tpu.dot_dimension_numbers<[1], [0], [0], [1], [0, 0, 1, 1], [], []>} : vector<2x48xf32>, vector<48x128xf32>, vector<2x128xf32> -> vector<2x128xf32>
    %cst_115 = arith.constant dense<0.000000e+00> : vector<2x128xf32>
    %325 = tpu.matmul %314, %1, %cst_115 {dimension_numbers = #tpu.dot_dimension_numbers<[1], [0], [0], [1], [0, 0, 1, 1], [], []>} : vector<2x32xf32>, vector<32x128xf32>, vector<2x128xf32> -> vector<2x128xf32>
    %326 = arith.addf %324, %325 : vector<2x128xf32>
    %327 = vector.broadcast %2 : vector<1x128xf32> to vector<2x128xf32>
    %328 = arith.addf %326, %327 : vector<2x128xf32>
    %329 = vector.extract_strided_slice %328 {offsets = [0, 0], sizes = [2, 32], strides = [1, 1]} : vector<2x128xf32> to vector<2x32xf32>
    %cst_116 = arith.constant 0.000000e+00 : f32
    %330 = vector.broadcast %cst_116 : f32 to vector<2x32xf32>
    %331 = arith.subf %330, %329 : vector<2x32xf32>
    %332 = math.exp %331 : vector<2x32xf32>
    %cst_117 = arith.constant 1.000000e+00 : f32
    %333 = vector.broadcast %cst_117 : f32 to vector<2x32xf32>
    %334 = arith.addf %333, %332 : vector<2x32xf32>
    %cst_118 = arith.constant 1.000000e+00 : f32
    %335 = vector.broadcast %cst_118 : f32 to vector<2x32xf32>
    %336 = arith.divf %335, %334 : vector<2x32xf32>
    %337 = vector.extract_strided_slice %328 {offsets = [0, 32], sizes = [2, 32], strides = [1, 1]} : vector<2x128xf32> to vector<2x32xf32>
    %cst_119 = arith.constant 0.000000e+00 : f32
    %338 = vector.broadcast %cst_119 : f32 to vector<2x32xf32>
    %339 = arith.subf %338, %337 : vector<2x32xf32>
    %340 = math.exp %339 : vector<2x32xf32>
    %cst_120 = arith.constant 1.000000e+00 : f32
    %341 = vector.broadcast %cst_120 : f32 to vector<2x32xf32>
    %342 = arith.addf %341, %340 : vector<2x32xf32>
    %cst_121 = arith.constant 1.000000e+00 : f32
    %343 = vector.broadcast %cst_121 : f32 to vector<2x32xf32>
    %344 = arith.divf %343, %342 : vector<2x32xf32>
    %345 = vector.extract_strided_slice %328 {offsets = [0, 64], sizes = [2, 32], strides = [1, 1]} : vector<2x128xf32> to vector<2x32xf32>
    %346 = math.tanh %345 : vector<2x32xf32>
    %347 = vector.extract_strided_slice %328 {offsets = [0, 96], sizes = [2, 32], strides = [1, 1]} : vector<2x128xf32> to vector<2x32xf32>
    %cst_122 = arith.constant 0.000000e+00 : f32
    %348 = vector.broadcast %cst_122 : f32 to vector<2x32xf32>
    %349 = arith.subf %348, %347 : vector<2x32xf32>
    %350 = math.exp %349 : vector<2x32xf32>
    %cst_123 = arith.constant 1.000000e+00 : f32
    %351 = vector.broadcast %cst_123 : f32 to vector<2x32xf32>
    %352 = arith.addf %351, %350 : vector<2x32xf32>
    %cst_124 = arith.constant 1.000000e+00 : f32
    %353 = vector.broadcast %cst_124 : f32 to vector<2x32xf32>
    %354 = arith.divf %353, %352 : vector<2x32xf32>
    %355 = arith.mulf %344, %312 : vector<2x32xf32>
    %356 = arith.mulf %336, %346 : vector<2x32xf32>
    %357 = arith.addf %355, %356 : vector<2x32xf32>
    %358 = math.tanh %357 : vector<2x32xf32>
    %359 = arith.mulf %354, %358 : vector<2x32xf32>
    %360 = arith.index_cast %c7_i32 : i32 to index
    %c0_125 = arith.constant 0 : index
    %c0_126 = arith.constant 0 : index
    %361 = vector.load %arg1[%360, %c0_125, %c0_126] : memref<8x2x1xf32, #tpu.memory_space<vmem>>, vector<1x2x1xf32>
    %362 = vector.shape_cast %361 : vector<1x2x1xf32> to vector<2x1xf32>
    %363 = vector.broadcast %362 : vector<2x1xf32> to vector<2x32xf32>
    %364 = arith.mulf %363, %359 : vector<2x32xf32>
    %365 = arith.addf %320, %364 : vector<2x32xf32>
    %c8_i32 = arith.constant 8 : i32
    %c0_127 = arith.constant 0 : index
    %c0_128 = arith.constant 0 : index
    %366 = vector.load %arg5[%c0_127, %c0_128] : memref<32x16xf32, #tpu.memory_space<vmem>>, vector<32x16xf32>
    %367 = arith.mulf %366, %366 : vector<32x16xf32>
    %cst_129 = arith.constant dense<0.000000e+00> : vector<16xf32>
    %368 = vector.multi_reduction <add>, %367, %cst_129 [0] : vector<32x16xf32> to vector<16xf32>
    %369 = vector.shape_cast %368 : vector<16xf32> to vector<1x16xf32>
    %370 = math.rsqrt %369 : vector<1x16xf32>
    %c0_130 = arith.constant 0 : index
    %c0_131 = arith.constant 0 : index
    %371 = vector.load %arg6[%c0_130, %c0_131] : memref<1x16xf32, #tpu.memory_space<vmem>>, vector<1x16xf32>
    %372 = arith.mulf %371, %370 : vector<1x16xf32>
    %373 = vector.broadcast %372 : vector<1x16xf32> to vector<32x16xf32>
    %374 = arith.mulf %366, %373 : vector<32x16xf32>
    %cst_132 = arith.constant dense<0.000000e+00> : vector<2x16xf32>
    %375 = tpu.matmul %365, %374, %cst_132 {dimension_numbers = #tpu.dot_dimension_numbers<[1], [0], [0], [1], [0, 0, 1, 1], [], []>} : vector<2x32xf32>, vector<32x16xf32>, vector<2x16xf32> -> vector<2x16xf32>
    %c0_133 = arith.constant 0 : index
    %c0_134 = arith.constant 0 : index
    %376 = vector.load %arg7[%c0_133, %c0_134] : memref<1x16xf32, #tpu.memory_space<vmem>>, vector<1x16xf32>
    %377 = vector.broadcast %376 : vector<1x16xf32> to vector<2x16xf32>
    %378 = arith.addf %375, %377 : vector<2x16xf32>
    %c0_135 = arith.constant 0 : index
    %c0_136 = arith.constant 0 : index
    %379 = vector.load %arg8[%c0_135, %c0_136] : memref<2x16xf32, #tpu.memory_space<vmem>>, vector<2x16xf32>
    %380 = arith.subf %379, %378 : vector<2x16xf32>
    %381 = arith.mulf %380, %380 : vector<2x16xf32>
    %cst_137 = arith.constant dense<0.000000e+00> : vector<2xf32>
    %382 = vector.multi_reduction <add>, %381, %cst_137 [1] : vector<2x16xf32> to vector<2xf32>
    %383 = vector.shape_cast %382 : vector<2xf32> to vector<2x1xf32>
    %cst_138 = arith.constant dense<0.000000e+00> : vector<1xf32>
    %384 = vector.multi_reduction <add>, %383, %cst_138 [0] : vector<2x1xf32> to vector<1xf32>
    %385 = vector.shape_cast %384 : vector<1xf32> to vector<1x1xf32>
    %cst_139 = arith.constant 3.200000e+01 : f32
    %386 = vector.broadcast %cst_139 : f32 to vector<1x1xf32>
    %387 = arith.divf %385, %386 : vector<1x1xf32>
    %c0_140 = arith.constant 0 : index
    %c0_141 = arith.constant 0 : index
    %388 = vector.load %arg9[%c0_140, %c0_141] : memref<1x1xf32, #tpu.memory_space<vmem>>, vector<1x1xf32>
    tpu.vector_store %arg9[%c0_140, %c0_141], %387 {strides = array<i32>} : memref<1x1xf32, #tpu.memory_space<vmem>>, vector<1x1xf32>,
    return
  }
}

</mosaic_0001>

<bundles_post_ra>
// kernel: rel_img_rec_forward.1
= control target key start
LH: loop header
LB: loop body
LE: loop exit
PB: predicated region body
PF: predicated region fallthrough
CT: control target
= control target key end

     0   :  { %14 = vsyncpa [#allocation3], 0  ;;  %s1464_s0 = inlined_call_operand.vmem [shape: f32[8,2,48], index: 0, kind: input, shape index: {}]   ;;  %s1465_s1 = inlined_call_operand.vmem [shape: f32[8,2,1], index: 1, kind: input, shape index: {}]   ;;  %s1466_s2 = inlined_call_operand.vmem [shape: f32[48,128], index: 2, kind: input, shape index: {}]   ;;  %s1467_s3 = inlined_call_operand.hbm [shape: f32[32,128], index: 3, kind: input, shape index: {}]   ;;  %s1468_s4 = inlined_call_operand.vmem [shape: f32[1,128], index: 4, kind: input, shape index: {}]   ;;  %s1469_s5 = inlined_call_operand.vmem [shape: f32[32,16], index: 5, kind: input, shape index: {}]   ;;  %s1470_s6 = inlined_call_operand.vmem [shape: f32[1,16], index: 6, kind: input, shape index: {}]   ;;  %s1471_s7 = inlined_call_operand.vmem [shape: f32[1,16], index: 7, kind: input, shape index: {}]   ;;  %s1472_s8 = inlined_call_operand.vmem [shape: f32[2,16], index: 8, kind: input, shape index: {}]   ;;  %s1473_s9 = inlined_call_operand.hbm [shape: f32[1,1], index: 9, kind: output, shape index: {}]  }
   0x1   :  { %15 = vsyncpa [#allocation4], 0  ;;  %s26_s11 = sshll.u32 %s1467_s3, 4  ;;  %s1113_s12 = smov [#allocation2]   ;;  %s27_s11 = int_to_ptr.hbm [resolvable:$true] %s26_s11 }
   0x2   :  { %s28_s13 = sshll.u32 %s1113_s12, 4  ;;  %s1114_s14 = smov 128   ;;  %s29_s13 = int_to_ptr.vmem [resolvable:$true] %s28_s13 }
   0x3   :  { %s1115_s15 = smov 8  }
   0x4   :  { %34 = dma.hbm_to_vmem [thread:$0]  %s27_s11, 512, %s29_s13, [#allocation3], %s1114_s14, %s1114_s14, %s1115_s15  }
   0x5   :  { %1109 = dma.done.wait [#allocation3], 512  }
   0x6   :  { %1110 = vsyncadd [#allocation3], 4294966784  ;;  %v1178_v0 = vld [vmem:[%s1466_s2 + $0x28] sm:$0xff]  ;;  %v1183_v1 = vld [vmem:[%s1466_s2 + $0x20] sm:$0xff]  ;;  %v1116_v10 = vmov 0.0   ;;  %vm85_vm0 = vcmask 392192  }
   0x7   :  { %v1185_v2 = vld [vmem:[#allocation2 + $0x18] sm:$0xff]  ;;  %99 = vmatpush.msra.mxu1 %v1178_v0  ;;  %v1189_v3 = vld [vmem:[#allocation2 + $0x10] sm:$0xff]  ;;  %v1196_v5 = vld [vmem:[#allocation2 + $0x8] sm:$0xff]  ;;  %198 = vmatpush.msra.mxu3 %v1178_v0  ;;  %s1117_s30 = smov 64   ;;  %vm61_vm5 = vcmask 261120  }
   0x8   :  { %77 = vmatpush.msra.mxu0 %v1185_v2  ;;  %v1194_v4 = vld [vmem:[%s1466_s2 + $0x18] sm:$0xff]  ;;  %177 = vmatpush.msra.mxu2 %v1185_v2  ;;  %v1205_v6 = vld [vmem:[%s1466_s2 + $0x10] sm:$0xff]  ;;  %v1207_v7 = vld [vmem:[#allocation2] sm:$0xff] }
   0x9   :  { %100 = vmatpush.msra.mxu1 %v1183_v1  ;;  %199 = vmatpush.msra.mxu3 %v1183_v1  ;;  %v1216_v8 = vld [vmem:[%s1466_s2 + $0x8] sm:$0xff]  ;;  %v1225_v9 = vld [vmem:[%s1466_s2] sm:$0xff] }
   0xa   :  { %78 = vmatpush.msra.mxu0 %v1189_v3  ;;  %178 = vmatpush.msra.mxu2 %v1189_v3  ;;  %v60_v11 = vld [vmem:[%s1464_s0] sm:$0x3]  ;;  %v950_v40 = vld [vmem:[%s1464_s0 + $0x2] sm:$0x3] }
   0xb   :  { %101 = vmatpush.msra.mxu1 %v1194_v4  ;;  %200 = vmatpush.msra.mxu3 %v1194_v4  ;;  %v1270_v13 = vld [vmem:[%s1468_s4] ss:$0 sm:$0xff]  ;;  %s1118_s4 = smov 32  }
   0xc   :  { %79 = vmatpush.msra.mxu0 %v1196_v5  ;;  %179 = vmatpush.msra.mxu2 %v1196_v5 }
   0xd   :  { %102 = vmatpush.msra.mxu1 %v1205_v6  ;;  %201 = vmatpush.msra.mxu3 %v1205_v6 }
   0xe   :  { %80 = vmatpush.msra.mxu0 %v1207_v7  ;;  %180 = vmatpush.msra.mxu2 %v1207_v7 }
   0xf   :  { %81 = vmatmul.f32.vlgmr.msra.gmra.mxu0 %v1116_v10  ;;  %103 = vmatpush.msra.mxu1 %v1216_v8 }
  0x10   :  { %202 = vmatpush.msra.mxu3 %v1216_v8  ;;  %295 = vmatpush.msrb.mxu2 %v1178_v0 }
  0x11   :  { %104 = vmatpush.msra.mxu1 %v1225_v9  ;;  %274 = vmatpush.msrb.mxu0 %v1185_v2 }
  0x12   :  { %949 = vmatmul.msk.f32.vlgmr.msra.gmra.mxu1 %vm85_vm0, %v60_v11  ;;  %203 = vmatpush.msra.mxu3 %v1225_v9 }
  0x13   :  { %296 = vmatpush.msrb.mxu2 %v1183_v1  ;;  %275 = vmatpush.msrb.mxu0 %v1189_v3 }
  0x14   :  { %392 = vmatpush.msrb.mxu3 %v1178_v0  ;;  %371 = vmatpush.msrb.mxu1 %v1185_v2 }
  0x15   :  { %297 = vmatpush.msrb.mxu2 %v1194_v4  ;;  %276 = vmatpush.msrb.mxu0 %v1196_v5 }
  0x16   :  { %393 = vmatpush.msrb.mxu3 %v1183_v1  ;;  %372 = vmatpush.msrb.mxu1 %v1189_v3 }
  0x17   :  { %298 = vmatpush.msrb.mxu2 %v1205_v6  ;;  %277 = vmatpush.msrb.mxu0 %v1207_v7 }
  0x18   :  { %394 = vmatpush.msrb.mxu3 %v1194_v4  ;;  %373 = vmatpush.msrb.mxu1 %v1196_v5 }
  0x19   :  { %299 = vmatpush.msrb.mxu2 %v1216_v8  ;;  %468 = vmatpush.msra.mxu0 %v1185_v2 }
  0x1a   :  { %395 = vmatpush.msrb.mxu3 %v1205_v6  ;;  %374 = vmatpush.msrb.mxu1 %v1207_v7 }
  0x1b   :  { %300 = vmatpush.msrb.mxu2 %v1225_v9  ;;  %469 = vmatpush.msra.mxu0 %v1189_v3 }
  0x1c   :  { %489 = vmatpush.msra.mxu1 %v1178_v0  ;;  %396 = vmatpush.msrb.mxu3 %v1216_v8 }
  0x1d   :  { %470 = vmatpush.msra.mxu0 %v1196_v5  ;;  %952 = vmatmul.msk.f32.vlgmr.msra.gmra.mxu3 %vm85_vm0, %v950_v40 }
  0x1e   :  { %490 = vmatpush.msra.mxu1 %v1183_v1  ;;  %397 = vmatpush.msrb.mxu3 %v1225_v9 }
  0x1f   :  { %471 = vmatpush.msra.mxu0 %v1207_v7 }
  0x20   :  { %491 = vmatpush.msra.mxu1 %v1194_v4  ;;  %662 = vmatpush.msra.mxu3 %v1185_v2 }
  0x22   :  { %492 = vmatpush.msra.mxu1 %v1205_v6  ;;  %663 = vmatpush.msra.mxu3 %v1189_v3 }
  0x24   :  { %493 = vmatpush.msra.mxu1 %v1216_v8  ;;  %664 = vmatpush.msra.mxu3 %v1196_v5 }
  0x26   :  { %494 = vmatpush.msra.mxu1 %v1225_v9  ;;  %665 = vmatpush.msra.mxu3 %v1207_v7 }
  0x8c   :  { %v82_v12 = vpop.f32.mrf.mxu0 }
  0x8f   :  { %v106_v14 = vpop.f32.mrf.mxu1 }
  0x90   :  { %v107_v15 = vadd.f32 %v106_v14, %v82_v12  ;;  %v954_v14 = vld [vmem:[%s1464_s0 + $0x4] sm:$0x3] }
  0x92   :  { %v112_v16 = vadd.f32 %v1270_v13, %v107_v15 }
  0x94   :  { %993 = vtanh.f32 %v112_v16  ;;  %v113_v18 = vsub.f32 0.0, %v112_v16 }
  0x96   :  { %v114_v19 = vmul.f32 1.442695, %v113_v18 }
  0x98   :  { %995 = vpow2.f32 %v114_v19 }
  0x9a   :  { %v994_v17 = vpop.eup %993 }
  0x9b   :  { %135 = vrot.lane.b32.xlu0 %v994_v17, %s1117_s30 }
  0x9e   :  { %v996_v20 = vpop.eup %995 }
  0x9f   :  { %v116_v21 = vadd.f32 1.0, %v996_v20 }
  0xa0   :  { %v205_v42 = vpop.f32.mrf.mxu3 }
  0xa1   :  { %997 = vrcp.f32 %v116_v21  ;;  %v128_v27 = vand.u32 2147483648, %v116_v21  ;;  %vm122_vm2 = vweird.f32 %v116_v21  ;;  %v126_v28 = vand.u32 2147483647, %v116_v21 }
  0xa3   :  { %v129_v30 = vor.u32 1.1754944e-38, %v128_v27  ;;  %vm127_vm4 = vcmp.eq.f32.partialorder %v126_v28, 8.507059e+37 }
  0xa7   :  { %v998_v22 = vpop.eup %997 }
  0xa8   :  { %v118_v23 = vmul.f32 %v998_v22, %v116_v21  ;;  %vm123_vm1 = vweird.f32 %v998_v22 }
  0xa9   :  { %vm124_vm3 = vmor %vm122_vm2, %vm123_vm1 }
  0xaa   :  { %v119_v24 = vsub.f32 1.0, %v118_v23 }
  0xac   :  { %v120_v25 = vmul.f32 %v998_v22, %v119_v24 }
  0xae   :  { %v121_v26 = vadd.f32 %v998_v22, %v120_v25 }
  0xb0   :  { %v125_v29 = vsel %vm124_vm3, %v998_v22, %v121_v26 }
  0xb1   :  { %v130_v32 = vsel %vm127_vm4, %v129_v30, %v125_v29 }
  0xb2   :  { %v133_v34 = vmul.f32 0.0, %v130_v32 }
 0x10d   :  { %v136_v31 = vpop.permute.xlu0 %135 }
 0x10e   :  { %v138_v33 = vmul.f32 %v136_v31, %v130_v32 }
 0x110   :  { %140 = vrot.lane.b32.xlu0 %v138_v33, %s1118_s4 }
 0x182   :  { %v141_v35 = vpop.permute.xlu0 %140 }
 0x183   :  { %v143_v36 = vadd.f32 %v141_v35, %v133_v34 }
 0x185   :  { %999 = vtanh.f32 %v143_v36 }
 0x18b   :  { %v1000_v37 = vpop.eup %999 }
 0x18c   :  { %146 = vrot.lane.b32.xlu1 %v1000_v37, %s1117_s30 }
 0x1fe   :  { %v147_v38 = vpop.permute.xlu1 %146 }
 0x1ff   :  { %v1276_v39 = vmul.f32 %v147_v38, %v130_v32 }
 0x201   :  { %161 = vrot.lane.b32.xlu1 %v1276_v39, %s1118_s4 }
 0x273   :  { %v162_v41 = vpop.permute.xlu1 %161 }
 0x274   :  { %951 = vmatmul.msk.f32.vlgmr.msra.gmra.mxu2 %vm61_vm5, %v162_v41 }
 0x275   :  { %565 = vmatpush.msra.mxu2 %v1185_v2 }
 0x277   :  { %566 = vmatpush.msra.mxu2 %v1189_v3 }
 0x279   :  { %567 = vmatpush.msra.mxu2 %v1196_v5 }
 0x27b   :  { %568 = vmatpush.msra.mxu2 %v1207_v7 }
 0x27c   :  { %956 = vmatmul.msk.f32.vlgmr.msrb.gmra.mxu2 %vm85_vm0, %v954_v14 }
 0x27d   :  { %683 = vmatpush.msrb.mxu2 %v1178_v0 }
 0x27f   :  { %684 = vmatpush.msrb.mxu2 %v1183_v1 }
 0x281   :  { %685 = vmatpush.msrb.mxu2 %v1194_v4 }
 0x283   :  { %686 = vmatpush.msrb.mxu2 %v1205_v6 }
 0x285   :  { %687 = vmatpush.msrb.mxu2 %v1216_v8 }
 0x287   :  { %688 = vmatpush.msrb.mxu2 %v1225_v9 }
 0x2f7   :  { %v182_v43 = vpop.f32.mrf.mxu2 }
 0x2f8   :  { %v206_v44 = vadd.f32 %v205_v42, %v182_v43 }
 0x2fa   :  { %v208_v45 = vadd.f32 %v1270_v13, %v206_v44  ;;  %v958_v44 = vld [vmem:[%s1464_s0 + $0x6] sm:$0x3] }
 0x2fb   :  { %960 = vmatmul.msk.f32.vlgmr.msrb.gmra.mxu3 %vm85_vm0, %v958_v44 }
 0x2fc   :  { %1001 = vtanh.f32 %v208_v45  ;;  %v209_v47 = vsub.f32 0.0, %v208_v45  ;;  %780 = vmatpush.msrb.mxu3 %v1178_v0 }
 0x2fe   :  { %v210_v48 = vmul.f32 1.442695, %v209_v47  ;;  %781 = vmatpush.msrb.mxu3 %v1183_v1 }
 0x2ff   :  { %v302_v18 = vpop.f32.mrf.mxu2 }
 0x300   :  { %1003 = vpow2.f32 %v210_v48  ;;  %782 = vmatpush.msrb.mxu3 %v1194_v4 }
 0x302   :  { %v1002_v46 = vpop.eup %1001  ;;  %783 = vmatpush.msrb.mxu3 %v1205_v6 }
 0x303   :  { %231 = vrot.lane.b32.xlu2 %v1002_v46, %s1117_s30 }
 0x304   :  { %784 = vmatpush.msrb.mxu3 %v1216_v8 }
 0x306   :  { %v1004_v49 = vpop.eup %1003  ;;  %785 = vmatpush.msrb.mxu3 %v1225_v9 }
 0x307   :  { %v212_v50 = vadd.f32 1.0, %v1004_v49 }
 0x309   :  { %1005 = vrcp.f32 %v212_v50  ;;  %v224_v56 = vand.u32 2147483648, %v212_v50  ;;  %vm218_vm7 = vweird.f32 %v212_v50  ;;  %v222_v57 = vand.u32 2147483647, %v212_v50 }
 0x30b   :  { %v225_v59 = vor.u32 1.1754944e-38, %v224_v56  ;;  %vm223_vm9 = vcmp.eq.f32.partialorder %v222_v57, 8.507059e+37 }
 0x30f   :  { %v1006_v51 = vpop.eup %1005 }
 0x310   :  { %v214_v52 = vmul.f32 %v1006_v51, %v212_v50  ;;  %vm219_vm6 = vweird.f32 %v1006_v51 }
 0x311   :  { %vm220_vm8 = vmor %vm218_vm7, %vm219_vm6 }
 0x312   :  { %v215_v53 = vsub.f32 1.0, %v214_v52 }
 0x314   :  { %v216_v54 = vmul.f32 %v1006_v51, %v215_v53 }
 0x316   :  { %v217_v55 = vadd.f32 %v1006_v51, %v216_v54 }
 0x318   :  { %v221_v58 = vsel %vm220_vm8, %v1006_v51, %v217_v55 }
 0x319   :  { %v226_v61 = vsel %vm223_vm9, %v225_v59, %v221_v58 }
 0x31a   :  { %v229_v63 = vmul.f32 %v226_v61, %v143_v36 }
 0x35d   :  { %v232_v60 = vpop.permute.xlu2 %231 }
 0x35e   :  { %v234_v62 = vmul.f32 %v232_v60, %v226_v61 }
 0x360   :  { %236 = vrot.lane.b32.xlu2 %v234_v62, %s1118_s4 }
 0x3ba   :  { %v237_v10 = vpop.permute.xlu2 %236 }
 0x3bb   :  { %v239_v11 = vadd.f32 %v237_v10, %v229_v63 }
 0x3bd   :  { %1007 = vtanh.f32 %v239_v11 }
 0x3c3   :  { %v1008_v12 = vpop.eup %1007 }
 0x3c4   :  { %242 = vrot.lane.b32.xlu0 %v1008_v12, %s1117_s30 }
 0x436   :  { %v243_v15 = vpop.permute.xlu0 %242 }
 0x437   :  { %v1307_v16 = vmul.f32 %v243_v15, %v226_v61 }
 0x439   :  { %258 = vrot.lane.b32.xlu1 %v1307_v16, %s1118_s4 }
 0x4ab   :  { %v259_v17 = vpop.permute.xlu1 %258 }
 0x4ac   :  { %955 = vmatmul.msk.f32.vlgmr.msrb.gmra.mxu0 %vm61_vm5, %v259_v17 }
 0x4ad   :  { %586 = vmatpush.msrb.mxu0 %v1178_v0  ;;  %v399_v0 = vpop.f32.mrf.mxu3 }
 0x4af   :  { %587 = vmatpush.msrb.mxu0 %v1183_v1 }
 0x4b1   :  { %588 = vmatpush.msrb.mxu0 %v1194_v4 }
 0x4b3   :  { %589 = vmatpush.msrb.mxu0 %v1205_v6 }
 0x4b5   :  { %590 = vmatpush.msrb.mxu0 %v1216_v8 }
 0x4b7   :  { %591 = vmatpush.msrb.mxu0 %v1225_v9 }
 0x529   :  { %v279_v19 = vpop.f32.mrf.mxu0 }
 0x52a   :  { %v303_v20 = vadd.f32 %v302_v18, %v279_v19 }
 0x52c   :  { %v305_v21 = vadd.f32 %v1270_v13, %v303_v20 }
 0x52e   :  { %1009 = vtanh.f32 %v305_v21  ;;  %v306_v23 = vsub.f32 0.0, %v305_v21 }
 0x530   :  { %v307_v24 = vmul.f32 1.442695, %v306_v23 }
 0x532   :  { %1011 = vpow2.f32 %v307_v24 }
 0x534   :  { %v1010_v22 = vpop.eup %1009 }
 0x535   :  { %328 = vrot.lane.b32.xlu2 %v1010_v22, %s1117_s30 }
 0x538   :  { %v1012_v25 = vpop.eup %1011 }
 0x539   :  { %v309_v26 = vadd.f32 1.0, %v1012_v25 }
 0x53b   :  { %1013 = vrcp.f32 %v309_v26  ;;  %v321_v32 = vand.u32 2147483648, %v309_v26  ;;  %vm315_vm11 = vweird.f32 %v309_v26  ;;  %v319_v33 = vand.u32 2147483647, %v309_v26 }
 0x53d   :  { %v322_v35 = vor.u32 1.1754944e-38, %v321_v32  ;;  %vm320_vm13 = vcmp.eq.f32.partialorder %v319_v33, 8.507059e+37 }
 0x541   :  { %v1014_v27 = vpop.eup %1013 }
 0x542   :  { %v311_v28 = vmul.f32 %v1014_v27, %v309_v26  ;;  %vm316_vm10 = vweird.f32 %v1014_v27 }
 0x543   :  { %vm317_vm12 = vmor %vm315_vm11, %vm316_vm10 }
 0x544   :  { %v312_v29 = vsub.f32 1.0, %v311_v28 }
 0x546   :  { %v313_v30 = vmul.f32 %v1014_v27, %v312_v29 }
 0x548   :  { %v314_v31 = vadd.f32 %v1014_v27, %v313_v30 }
 0x54a   :  { %v318_v34 = vsel %vm317_vm12, %v1014_v27, %v314_v31 }
 0x54b   :  { %v323_v37 = vsel %vm320_vm13, %v322_v35, %v318_v34 }
 0x54c   :  { %v326_v40 = vmul.f32 %v323_v37, %v239_v11  ;;  %v962_v11 = vld [vmem:[%s1464_s0 + $0x8] sm:$0x3] }
 0x58f   :  { %v329_v36 = vpop.permute.xlu2 %328 }
 0x590   :  { %v331_v38 = vmul.f32 %v329_v36, %v323_v37 }
 0x592   :  { %333 = vrot.lane.b32.xlu0 %v331_v38, %s1118_s4 }
 0x604   :  { %v334_v41 = vpop.permute.xlu0 %333 }
 0x605   :  { %v336_v42 = vadd.f32 %v334_v41, %v326_v40 }
 0x607   :  { %1015 = vtanh.f32 %v336_v42 }
 0x60d   :  { %v1016_v43 = vpop.eup %1015 }
 0x60e   :  { %339 = vrot.lane.b32.xlu1 %v1016_v43, %s1117_s30  ;;  %v966_v43 = vld [vmem:[%s1464_s0 + $0xa] sm:$0x3] }
 0x680   :  { %v340_v45 = vpop.permute.xlu1 %339 }
 0x681   :  { %v1332_v46 = vmul.f32 %v340_v45, %v323_v37 }
 0x683   :  { %355 = vrot.lane.b32.xlu2 %v1332_v46, %s1118_s4 }
 0x6dd   :  { %v356_v47 = vpop.permute.xlu2 %355 }
 0x6de   :  { %959 = vmatmul.msk.f32.vlgmr.msrb.gmra.mxu1 %vm61_vm5, %v356_v47 }
 0x6df   :  { %759 = vmatpush.msrb.mxu1 %v1185_v2 }
 0x6e1   :  { %760 = vmatpush.msrb.mxu1 %v1189_v3 }
 0x6e3   :  { %761 = vmatpush.msrb.mxu1 %v1196_v5 }
 0x6e5   :  { %762 = vmatpush.msrb.mxu1 %v1207_v7 }
 0x6e6   :  { %964 = vmatmul.msk.f32.vlgmr.msra.gmra.mxu1 %vm85_vm0, %v962_v11 }
 0x75b   :  { %v376_v1 = vpop.f32.mrf.mxu1 }
 0x75c   :  { %v400_v4 = vadd.f32 %v399_v0, %v376_v1 }
 0x75e   :  { %v402_v6 = vadd.f32 %v1270_v13, %v400_v4 }
 0x760   :  { %1017 = vtanh.f32 %v402_v6  ;;  %v403_v9 = vsub.f32 0.0, %v402_v6 }
 0x762   :  { %v404_v48 = vmul.f32 1.442695, %v403_v9 }
 0x763   :  { %v496_v14 = vpop.f32.mrf.mxu1 }
 0x764   :  { %1019 = vpow2.f32 %v404_v48 }
 0x766   :  { %v1018_v8 = vpop.eup %1017 }
 0x767   :  { %425 = vrot.lane.b32.xlu0 %v1018_v8, %s1117_s30 }
 0x76a   :  { %v1020_v49 = vpop.eup %1019 }
 0x76b   :  { %v406_v2 = vadd.f32 1.0, %v1020_v49 }
 0x76d   :  { %1021 = vrcp.f32 %v406_v2  ;;  %v418_v52 = vand.u32 2147483648, %v406_v2  ;;  %vm412_vm15 = vweird.f32 %v406_v2  ;;  %v416_v53 = vand.u32 2147483647, %v406_v2 }
 0x76f   :  { %v419_v55 = vor.u32 1.1754944e-38, %v418_v52  ;;  %vm417_vm2 = vcmp.eq.f32.partialorder %v416_v53, 8.507059e+37 }
 0x773   :  { %v1022_v3 = vpop.eup %1021 }
 0x774   :  { %v408_v50 = vmul.f32 %v1022_v3, %v406_v2  ;;  %vm413_vm14 = vweird.f32 %v1022_v3 }
 0x775   :  { %vm414_vm1 = vmor %vm412_vm15, %vm413_vm14 }
 0x776   :  { %v409_v5 = vsub.f32 1.0, %v408_v50 }
 0x778   :  { %v410_v51 = vmul.f32 %v1022_v3, %v409_v5 }
 0x77a   :  { %v411_v7 = vadd.f32 %v1022_v3, %v410_v51 }
 0x77c   :  { %v415_v54 = vsel %vm414_vm1, %v1022_v3, %v411_v7 }
 0x77d   :  { %v420_v57 = vsel %vm417_vm2, %v419_v55, %v415_v54 }
 0x77e   :  { %v423_v59 = vmul.f32 %v420_v57, %v336_v42 }
 0x7d9   :  { %v426_v56 = vpop.permute.xlu0 %425 }
 0x7da   :  { %v428_v58 = vmul.f32 %v426_v56, %v420_v57 }
 0x7dc   :  { %430 = vrot.lane.b32.xlu1 %v428_v58, %s1118_s4 }
 0x84e   :  { %v431_v60 = vpop.permute.xlu1 %430 }
 0x84f   :  { %v433_v61 = vadd.f32 %v431_v60, %v423_v59 }
 0x851   :  { %1023 = vtanh.f32 %v433_v61 }
 0x857   :  { %v1024_v62 = vpop.eup %1023 }
 0x858   :  { %436 = vrot.lane.b32.xlu2 %v1024_v62, %s1117_s30 }
 0x8b2   :  { %v437_v63 = vpop.permute.xlu2 %436 }
 0x8b3   :  { %v1345_v10 = vmul.f32 %v437_v63, %v420_v57  ;;  %v970_v63 = vld [vmem:[%s1464_s0 + $0xc] sm:$0x3] }
 0x8b5   :  { %452 = vrot.lane.b32.xlu0 %v1345_v10, %s1118_s4 }
 0x927   :  { %v453_v12 = vpop.permute.xlu0 %452 }
 0x928   :  { %963 = vmatmul.msk.f32.vlgmr.msra.gmra.mxu0 %vm61_vm5, %v453_v12 }
 0x930   :  { %968 = vmatmul.msk.f32.vlgmr.msrb.gmra.mxu0 %vm85_vm0, %v966_v43 }
 0x9a5   :  { %v473_v15 = vpop.f32.mrf.mxu0 }
 0x9a6   :  { %v497_v17 = vadd.f32 %v496_v14, %v473_v15 }
 0x9a8   :  { %v499_v18 = vadd.f32 %v1270_v13, %v497_v17 }
 0x9aa   :  { %1025 = vtanh.f32 %v499_v18  ;;  %v500_v20 = vsub.f32 0.0, %v499_v18 }
 0x9ac   :  { %v501_v21 = vmul.f32 1.442695, %v500_v20 }
 0x9ad   :  { %v593_v45 = vpop.f32.mrf.mxu0 }
 0x9ae   :  { %1027 = vpow2.f32 %v501_v21 }
 0x9b0   :  { %v1026_v19 = vpop.eup %1025 }
 0x9b1   :  { %522 = vrot.lane.b32.xlu1 %v1026_v19, %s1117_s30 }
 0x9b4   :  { %v1028_v22 = vpop.eup %1027 }
 0x9b5   :  { %v503_v23 = vadd.f32 1.0, %v1028_v22 }
 0x9b7   :  { %1029 = vrcp.f32 %v503_v23  ;;  %v515_v29 = vand.u32 2147483648, %v503_v23  ;;  %vm509_vm4 = vweird.f32 %v503_v23  ;;  %v513_v30 = vand.u32 2147483647, %v503_v23 }
 0x9b9   :  { %v516_v32 = vor.u32 1.1754944e-38, %v515_v29  ;;  %vm514_vm7 = vcmp.eq.f32.partialorder %v513_v30, 8.507059e+37 }
 0x9bd   :  { %v1030_v24 = vpop.eup %1029 }
 0x9be   :  { %v505_v25 = vmul.f32 %v1030_v24, %v503_v23  ;;  %vm510_vm3 = vweird.f32 %v1030_v24 }
 0x9bf   :  { %vm511_vm6 = vmor %vm509_vm4, %vm510_vm3  ;;  %vm845_vm4 = vcmask 130048  }
 0x9c0   :  { %v506_v26 = vsub.f32 1.0, %v505_v25 }
 0x9c2   :  { %v507_v27 = vmul.f32 %v1030_v24, %v506_v26 }
 0x9c4   :  { %v508_v28 = vadd.f32 %v1030_v24, %v507_v27 }
 0x9c6   :  { %v512_v31 = vsel %vm511_vm6, %v1030_v24, %v508_v28 }
 0x9c7   :  { %v517_v34 = vsel %vm514_vm7, %v516_v32, %v512_v31 }
 0x9c8   :  { %v520_v36 = vmul.f32 %v517_v34, %v433_v61 }
 0xa23   :  { %v523_v33 = vpop.permute.xlu1 %522 }
 0xa24   :  { %v525_v35 = vmul.f32 %v523_v33, %v517_v34 }
 0xa26   :  { %527 = vrot.lane.b32.xlu2 %v525_v35, %s1118_s4 }
 0xa80   :  { %v528_v37 = vpop.permute.xlu2 %527 }
 0xa81   :  { %v530_v38 = vadd.f32 %v528_v37, %v520_v36 }
 0xa83   :  { %1031 = vtanh.f32 %v530_v38 }
 0xa89   :  { %v1032_v40 = vpop.eup %1031 }
 0xa8a   :  { %533 = vrot.lane.b32.xlu0 %v1032_v40, %s1117_s30  ;;  %v1119_v40 = vmov 0  }
 0xa8b   :  { %988 = vset.pattern.permute.xlu0 %v1119_v40  ;;  %989 = vset.pattern.permute.xlu1 %v1119_v40 }
 0xa8c   :  { %990 = vset.pattern.permute.xlu2 %v1119_v40 }
 0xafc   :  { %v534_v41 = vpop.permute.xlu0 %533 }
 0xafd   :  { %v1358_v42 = vmul.f32 %v534_v41, %v517_v34  ;;  %v974_v41 = vld [vmem:[%s1464_s0 + $0xe] sm:$0x3]  ;;  %s939_s0 = sshll.u32 %s1473_s9, 4  ;;  %s940_s0 = int_to_ptr.hbm [resolvable:$true] %s939_s0 }
 0xaff   :  { %549 = vrot.lane.b32.xlu1 %v1358_v42, %s1118_s4 }
 0xb71   :  { %v550_v44 = vpop.permute.xlu1 %549 }
 0xb72   :  { %967 = vmatmul.msk.f32.vlgmr.msra.gmra.mxu2 %vm61_vm5, %v550_v44 }
 0xb7a   :  { %972 = vmatmul.msk.f32.vlgmr.msrb.gmra.mxu2 %vm85_vm0, %v970_v63 }
 0xbf5   :  { %v570_v47 = vpop.f32.mrf.mxu2 }
 0xbf6   :  { %v594_v0 = vadd.f32 %v593_v45, %v570_v47  ;;  %v150_v45 = vld [vmem:[%s1465_s1] sm:$0x3]  ;;  %v969_v47 = vld [vmem:[%s1465_s1 + $0xa] sm:$0x3] }
 0xbf8   :  { %v596_v1 = vadd.f32 %v1270_v13, %v594_v0 }
 0xbfa   :  { %1033 = vtanh.f32 %v596_v1  ;;  %v597_v6 = vsub.f32 0.0, %v596_v1 }
 0xbfc   :  { %v598_v8 = vmul.f32 1.442695, %v597_v6 }
 0xbfd   :  { %v690_v12 = vpop.f32.mrf.mxu2 }
 0xbfe   :  { %1035 = vpow2.f32 %v598_v8 }
 0xc00   :  { %v1034_v4 = vpop.eup %1033 }
 0xc01   :  { %619 = vrot.lane.b32.xlu2 %v1034_v4, %s1117_s30 }
 0xc04   :  { %v1036_v9 = vpop.eup %1035 }
 0xc05   :  { %v600_v48 = vadd.f32 1.0, %v1036_v9 }
 0xc07   :  { %1037 = vrcp.f32 %v600_v48  ;;  %v612_v51 = vand.u32 2147483648, %v600_v48  ;;  %vm606_vm9 = vweird.f32 %v600_v48  ;;  %v610_v7 = vand.u32 2147483647, %v600_v48 }
 0xc09   :  { %v613_v53 = vor.u32 1.1754944e-38, %v612_v51  ;;  %vm611_vm11 = vcmp.eq.f32.partialorder %v610_v7, 8.507059e+37 }
 0xc0d   :  { %v1038_v49 = vpop.eup %1037 }
 0xc0e   :  { %v602_v2 = vmul.f32 %v1038_v49, %v600_v48  ;;  %vm607_vm8 = vweird.f32 %v1038_v49  ;;  %v953_v48 = vld [vmem:[%s1465_s1 + $0x2] sm:$0x3] }
 0xc0f   :  { %vm608_vm10 = vmor %vm606_vm9, %vm607_vm8  ;;  %vm910_vm9 = vcmask 123904  }
 0xc10   :  { %v603_v3 = vsub.f32 1.0, %v602_v2  ;;  %v973_v2 = vld [vmem:[%s1465_s1 + $0xc] sm:$0x3] }
 0xc12   :  { %v604_v50 = vmul.f32 %v1038_v49, %v603_v3 }
 0xc14   :  { %v605_v5 = vadd.f32 %v1038_v49, %v604_v50 }
 0xc16   :  { %v609_v52 = vsel %vm608_vm10, %v1038_v49, %v605_v5  ;;  %v961_v49 = vld [vmem:[%s1465_s1 + $0x6] sm:$0x3] }
 0xc17   :  { %v614_v55 = vsel %vm611_vm11, %v613_v53, %v609_v52  ;;  %vm930_vm11 = vcmask 0  }
 0xc18   :  { %v617_v57 = vmul.f32 %v614_v55, %v530_v38 }
 0xc5b   :  { %v620_v54 = vpop.permute.xlu2 %619 }
 0xc5c   :  { %v622_v56 = vmul.f32 %v620_v54, %v614_v55 }
 0xc5e   :  { %624 = vrot.lane.b32.xlu0 %v622_v56, %s1118_s4 }
 0xcd0   :  { %v625_v58 = vpop.permute.xlu0 %624 }
 0xcd1   :  { %v627_v59 = vadd.f32 %v625_v58, %v617_v57 }
 0xcd3   :  { %1039 = vtanh.f32 %v627_v59 }
 0xcd9   :  { %v1040_v60 = vpop.eup %1039 }
 0xcda   :  { %630 = vrot.lane.b32.xlu1 %v1040_v60, %s1117_s30 }
 0xd4c   :  { %v631_v61 = vpop.permute.xlu1 %630 }
 0xd4d   :  { %v1371_v62 = vmul.f32 %v631_v61, %v614_v55  ;;  %v977_v55 = vld [vmem:[%s1465_s1 + $0xe] sm:$0x3] }
 0xd4f   :  { %646 = vrot.lane.b32.xlu2 %v1371_v62, %s1118_s4 }
 0xda9   :  { %v647_v11 = vpop.permute.xlu2 %646 }
 0xdaa   :  { %971 = vmatmul.msk.f32.vlgmr.msra.gmra.mxu3 %vm61_vm5, %v647_v11  ;;  %v957_v11 = vld [vmem:[%s1465_s1 + $0x4] sm:$0x3] }
 0xdb2   :  { %976 = vmatmul.msk.f32.vlgmr.msrb.gmra.mxu3 %vm85_vm0, %v974_v41 }
 0xe2d   :  { %v667_v14 = vpop.f32.mrf.mxu3 }
 0xe2e   :  { %v691_v15 = vadd.f32 %v690_v12, %v667_v14  ;;  %v965_v12 = vld [vmem:[%s1465_s1 + $0x8] sm:$0x3] }
 0xe30   :  { %v693_v17 = vadd.f32 %v1270_v13, %v691_v15 }
 0xe32   :  { %1041 = vtanh.f32 %v693_v17  ;;  %v694_v19 = vsub.f32 0.0, %v693_v17 }
 0xe34   :  { %v695_v20 = vmul.f32 1.442695, %v694_v19  ;;  %v1424_v19 = vld [vmem:[%s1469_s5] sm:$0xff] }
 0xe35   :  { %v787_v1 = vpop.f32.mrf.mxu3 }
 0xe36   :  { %1043 = vpow2.f32 %v695_v20  ;;  %v1429_v20 = vld [vmem:[%s1469_s5 + $0x8] sm:$0xff] }
 0xe38   :  { %v1042_v18 = vpop.eup %1041 }
 0xe39   :  { %716 = vrot.lane.b32.xlu0 %v1042_v18, %s1117_s30 }
 0xe3c   :  { %v1044_v21 = vpop.eup %1043 }
 0xe3d   :  { %v697_v22 = vadd.f32 1.0, %v1044_v21  ;;  %v839_v21 = vld [vmem:[%s1469_s5 + $0x10] sm:$0xff] }
 0xe3f   :  { %1045 = vrcp.f32 %v697_v22  ;;  %v709_v28 = vand.u32 2147483648, %v697_v22  ;;  %vm703_vm13 = vweird.f32 %v697_v22  ;;  %v707_v29 = vand.u32 2147483647, %v697_v22 }
 0xe41   :  { %v710_v31 = vor.u32 1.1754944e-38, %v709_v28  ;;  %vm708_vm15 = vcmp.eq.f32.partialorder %v707_v29, 8.507059e+37 }
 0xe45   :  { %v1046_v23 = vpop.eup %1045 }
 0xe46   :  { %v699_v24 = vmul.f32 %v1046_v23, %v697_v22  ;;  %vm704_vm12 = vweird.f32 %v1046_v23  ;;  %v840_v22 = vld [vmem:[%s1469_s5 + $0x18] sm:$0xff] }
 0xe47   :  { %vm705_vm14 = vmor %vm703_vm13, %vm704_vm12 }
 0xe48   :  { %v700_v25 = vsub.f32 1.0, %v699_v24  ;;  %v842_v24 = vmul.f32 %v1429_v20, %v1429_v20 }
 0xe4a   :  { %v701_v26 = vmul.f32 %v1046_v23, %v700_v25  ;;  %v843_v25 = vmul.f32 %v839_v21, %v839_v21 }
 0xe4c   :  { %v702_v27 = vadd.f32 %v1046_v23, %v701_v26  ;;  %v844_v26 = vmul.f32 %v840_v22, %v840_v22 }
 0xe4e   :  { %v706_v30 = vsel %vm705_vm14, %v1046_v23, %v702_v27  ;;  %v841_v23 = vmul.f32 %v1424_v19, %v1424_v19 }
 0xe4f   :  { %v711_v33 = vsel %vm708_vm15, %v710_v31, %v706_v30  ;;  %v847_v30 = vsel %vm845_vm4, %v842_v24, 0.0  ;;  %v849_v31 = vsel %vm845_vm4, %v843_v25, 0.0 }
 0xe50   :  { %v714_v35 = vmul.f32 %v711_v33, %v627_v59  ;;  %v846_v29 = vsel %vm845_vm4, %v841_v23, 0.0 }
 0xeab   :  { %v717_v32 = vpop.permute.xlu0 %716 }
 0xeac   :  { %v719_v34 = vmul.f32 %v717_v32, %v711_v33  ;;  %v848_v32 = vadd.f32 %v847_v30, %v846_v29 }
 0xeae   :  { %721 = vrot.lane.b32.xlu1 %v719_v34, %s1118_s4  ;;  %v850_v34 = vadd.f32 %v849_v31, %v848_v32 }
 0xf20   :  { %v722_v36 = vpop.permute.xlu1 %721 }
 0xf21   :  { %v724_v37 = vadd.f32 %v722_v36, %v714_v35 }
 0xf23   :  { %1047 = vtanh.f32 %v724_v37 }
 0xf29   :  { %v1048_v38 = vpop.eup %1047 }
 0xf2a   :  { %727 = vrot.lane.b32.xlu2 %v1048_v38, %s1117_s30 }
 0xf84   :  { %v728_v43 = vpop.permute.xlu2 %727 }
 0xf85   :  { %v1388_v44 = vmul.f32 %v728_v43, %v711_v33  ;;  %v851_v33 = vsel %vm845_vm4, %v844_v26, 0.0 }
 0xf87   :  { %743 = vrot.lane.b32.xlu0 %v1388_v44, %s1118_s4 }
 0xf8f   :  { %153 = vperm.xlu0 %988, %v150_v45  }
 0xf97   :  { %638 = vperm.xlu0 %988, %v969_v47  }
 0xf9f   :  { %832 = vperm.xlu0 %988, %v977_v55  }
 0xff9   :  { %v744_v0 = vpop.permute.xlu0 %743 }
 0xffa   :  { %975 = vmatmul.msk.f32.vlgmr.msrb.gmra.mxu1 %vm61_vm5, %v744_v0 }
0x1001   :  { %v154_v35 = vpop.permute.xlu0 %153 }
0x1002   :  { %v156_v38 = vmul.f32 %v154_v35, %v1276_v39 }
0x1077   :  { %v764_v4 = vpop.f32.mrf.mxu1 }
0x1078   :  { %v788_v6 = vadd.f32 %v787_v1, %v764_v4 }
0x107a   :  { %v790_v8 = vadd.f32 %v1270_v13, %v788_v6 }
0x107c   :  { %1049 = vtanh.f32 %v790_v8  ;;  %v791_v13 = vsub.f32 0.0, %v790_v8 }
0x107e   :  { %v792_v3 = vmul.f32 1.442695, %v791_v13 }
0x1080   :  { %1051 = vpow2.f32 %v792_v3 }
0x1082   :  { %v1050_v9 = vpop.eup %1049 }
0x1083   :  { %813 = vrot.lane.b32.xlu1 %v1050_v9, %s1117_s30 }
0x1086   :  { %v1052_v50 = vpop.eup %1051 }
0x1087   :  { %v794_v5 = vadd.f32 1.0, %v1052_v50 }
0x1089   :  { %1053 = vrcp.f32 %v794_v5  ;;  %v806_v56 = vand.u32 2147483648, %v794_v5  ;;  %vm800_vm1 = vweird.f32 %v794_v5  ;;  %v804_v57 = vand.u32 2147483647, %v794_v5 }
0x108b   :  { %250 = vperm.xlu1 %989, %v953_v48   ;;  %v807_v59 = vor.u32 1.1754944e-38, %v806_v56  ;;  %vm805_vm3 = vcmp.eq.f32.partialorder %v804_v57, 8.507059e+37 }
0x108f   :  { %v1054_v51 = vpop.eup %1053 }
0x1090   :  { %v796_v7 = vmul.f32 %v1054_v51, %v794_v5  ;;  %vm801_vm0 = vweird.f32 %v1054_v51 }
0x1091   :  { %vm802_vm2 = vmor %vm800_vm1, %vm801_vm0 }
0x1092   :  { %v797_v52 = vsub.f32 1.0, %v796_v7 }
0x1093   :  { %444 = vperm.xlu1 %989, %v961_v49  }
0x1094   :  { %v798_v53 = vmul.f32 %v1054_v51, %v797_v52 }
0x1096   :  { %v799_v54 = vadd.f32 %v1054_v51, %v798_v53 }
0x1098   :  { %v803_v58 = vsel %vm802_vm2, %v1054_v51, %v799_v54 }
0x1099   :  { %v808_v61 = vsel %vm805_vm3, %v807_v59, %v803_v58 }
0x109a   :  { %v811_v14 = vmul.f32 %v808_v61, %v724_v37  ;;  %v852_v37 = vadd.f32 %v851_v33, %v850_v34 }
0x109b   :  { %735 = vperm.xlu1 %989, %v973_v2  }
0x109c   :  { %v853_v41 = vrot.slane %v852_v37, 4 }
0x109e   :  { %v854_v45 = vadd.f32 %v853_v41, %v852_v37 }
0x10a0   :  { %v855_v4 = vrot.slane %v854_v45, 2 }
0x10a2   :  { %v856_v9 = vadd.f32 %v855_v4, %v854_v45 }
0x10a4   :  { %v857_v49 = vrot.slane %v856_v9, 1 }
0x10a6   :  { %v858_v13 = vadd.f32 %v857_v49, %v856_v9 }
0x10a8   :  { %vm865_vm6 = vweird.f32 %v858_v13 }
0x10f5   :  { %v814_v60 = vpop.permute.xlu1 %813 }
0x10f6   :  { %v816_v63 = vmul.f32 %v814_v60, %v808_v61 }
0x10f8   :  { %818 = vrot.lane.b32.xlu2 %v816_v63, %s1118_s4 }
0x10fd   :  { %v251_v27 = vpop.permute.xlu1 %250 }
0x10fe   :  { %v253_v36 = vmul.f32 %v251_v27, %v1307_v16  ;;  %v639_v16 = vpop.permute.xlu0 %638 }
0x10ff   :  { %v641_v39 = vmul.f32 %v639_v16, %v1371_v62 }
0x1100   :  { %347 = vperm.xlu2 %990, %v957_v11   ;;  %v254_v43 = vadd.f32 %v253_v36, %v156_v38 }
0x1105   :  { %v445_v47 = vpop.permute.xlu1 %444 }
0x1106   :  { %v447_v6 = vmul.f32 %v445_v47, %v1345_v10  ;;  %v833_v7 = vpop.permute.xlu0 %832 }
0x1108   :  { %541 = vperm.xlu2 %990, %v965_v12  }
0x1152   :  { %v819_v15 = vpop.permute.xlu2 %818 }
0x1153   :  { %v821_v17 = vadd.f32 %v819_v15, %v811_v14  ;;  %v992_v15 = vld [vmem:[%s1471_s7] ss:$0 sm:$0xff]  ;;  %s1121_s7 = smov [#allocation5]  }
0x1155   :  { %1055 = vtanh.f32 %v821_v17 }
0x1156   :  { %1057 = vrsqrt.f32 %v858_v13 }
0x115a   :  { %v348_v28 = vpop.permute.xlu2 %347 }
0x115b   :  { %v1056_v18 = vpop.eup %1055  ;;  %v350_v40 = vmul.f32 %v348_v28, %v1332_v46  ;;  %v736_v46 = vpop.permute.xlu1 %735 }
0x115c   :  { %824 = vrot.lane.b32.xlu2 %v1056_v18, %s1117_s30  ;;  %v738_v5 = vmul.f32 %v736_v46, %v1388_v44  ;;  %v1058_v52 = vpop.eup %1057  ;;  %v869_v44 = vld [vmem:[%s1470_s6] sm:$0x1] }
0x115d   :  { %v351_v1 = vadd.f32 %v350_v40, %v254_v43  ;;  %vm866_vm7 = vweird.f32 %v1058_v52  ;;  %v907_v18 = vld [vmem:[%s1472_s8] sm:$0x3]  ;;  %s937_s8 = sshll.u32 %s1121_s7, 4  ;;  %s938_s8 = int_to_ptr.vmem [resolvable:$true] %s937_s8 }
0x115e   :  { %vm867_vm8 = vmor %vm865_vm6, %vm866_vm7 }
0x115f   :  { %v448_v48 = vadd.f32 %v447_v6, %v351_v1 }
0x1162   :  { %v542_v0 = vpop.permute.xlu2 %541 }
0x1163   :  { %v544_v8 = vmul.f32 %v542_v0, %v1358_v42  ;;  %v860_v42 = vmul.f32 %v1058_v52, %v858_v13 }
0x1165   :  { %v545_v2 = vadd.f32 %v544_v8, %v448_v48  ;;  %v861_v55 = vmul.f32 %v1058_v52, %v860_v42 }
0x1167   :  { %v642_v3 = vadd.f32 %v641_v39, %v545_v2  ;;  %v862_v56 = vmul.f32 0.5, %v861_v55 }
0x1169   :  { %v739_v53 = vadd.f32 %v738_v5, %v642_v3  ;;  %v863_v62 = vsub.f32 1.5, %v862_v56 }
0x116b   :  { %v864_v57 = vmul.f32 %v1058_v52, %v863_v62 }
0x116d   :  { %v868_v58 = vsel %vm867_vm8, %v1058_v52, %v864_v57 }
0x116e   :  { %v870_v59 = vmul.f32 %v869_v44, %v868_v58 }
0x1170   :  { %v872_v60 = vperm.slane %v870_v59, 0 }
0x1172   :  { %v876_v63 = vmul.f32 %v872_v60, %v839_v21  ;;  %v875_v11 = vmul.f32 %v872_v60, %v1429_v20  ;;  %v874_v12 = vmul.f32 %v872_v60, %v1424_v19  ;;  %v1120_v19 = vmov 32.0  }
0x1173   :  { %1059 = vrcp.f32 %v1120_v19 }
0x1179   :  { %v1060_v24 = vpop.eup %1059 }
0x117a   :  { %v923_v25 = vmul.f32 32.0, %v1060_v24  ;;  %vm927_vm10 = vweird.f32 %v1060_v24 }
0x117c   :  { %v924_v26 = vsub.f32 1.0, %v923_v25 }
0x117e   :  { %v925_v30 = vmul.f32 %v1060_v24, %v924_v26 }
0x1180   :  { %v926_v33 = vadd.f32 %v1060_v24, %v925_v30 }
0x1182   :  { %v928_v36 = vsel %vm927_vm10, %v1060_v24, %v926_v33 }
0x11b6   :  { %v825_v50 = vpop.permute.xlu2 %824 }
0x11b7   :  { %v827_v51 = vmul.f32 %v825_v50, %v808_v61  ;;  %v877_v61 = vmul.f32 %v872_v60, %v840_v22 }
0x11b9   :  { %v835_v10 = vmul.f32 %v833_v7, %v827_v51  ;;  %899 = vmatpush.msra.mxu0 %v877_v61 }
0x11bb   :  { %v836_v54 = vadd.f32 %v835_v10, %v739_v53  ;;  %900 = vmatpush.msra.mxu0 %v876_v63 }
0x11bd   :  { %883 = vrot.lane.b32.xlu1 %v836_v54, %s1118_s4  ;;  %901 = vmatpush.msra.mxu0 %v875_v11 }
0x11bf   :  { %902 = vmatpush.msra.mxu0 %v874_v12 }
0x122f   :  { %v884_v14 = vpop.permute.xlu1 %883 }
0x1230   :  { %978 = vmatmul.msk.f32.vlgmr.msra.gmra.mxu0 %vm61_vm5, %v884_v14  ;;  %vm914_vm5 = vcmask 1041408  }
0x12ad   :  { %v904_v17 = vpop.f32.mrf.mxu0 }
0x12ae   :  { %v905_v21 = vadd.f32 %v992_v15, %v904_v17 }
0x12b0   :  { %v908_v22 = vsub.f32 %v907_v18, %v905_v21 }
0x12b2   :  { %v909_v20 = vmul.f32 %v908_v22, %v908_v22 }
0x12b4   :  { %v911_v23 = vsel %vm910_vm9, %v909_v20, 0.0 }
0x12b5   :  { %912 = vadd.xlane.f32.xlu2 %v911_v23 }
0x1328   :  { %v913_v27 = vpop.xlane.xlu2 %912 }
0x1329   :  { %v915_v28 = vsel %vm914_vm5, %v913_v27, 0.0 }
0x132a   :  { %v916_v29 = vrot.slane %v915_v28, 4 }
0x132c   :  { %v917_v31 = vadd.f32 %v916_v29, %v915_v28 }
0x132e   :  { %v918_v32 = vrot.slane %v917_v31, 2 }
0x1330   :  { %v919_v34 = vadd.f32 %v918_v32, %v917_v31 }
0x1332   :  { %v920_v35 = vrot.slane %v919_v34, 1 }
0x1334   :  { %v921_v37 = vadd.f32 %v920_v35, %v919_v34 }
0x1336   :  { %v929_v38 = vmul.f32 %v928_v36, %v921_v37 }
0x1338   :  { %931 = vst.msk [vmem:[#allocation5] sm:$0x1] %vm930_vm11, %v929_v38 }
0x1339   :  { %942 = dma.vmem_to_hbm [thread:$0]  %s938_s8, 16, %s940_s0, [#allocation4]  }
0x133a   :  { %1111 = dma.done.wait [#allocation4], 16  }
0x133b   :  { %1112 = vsyncadd [#allocation4], 4294967280 }
0x133c   :  { %947 = vsyncpa [#allocation3], 1 }
0x133d   :  { %948 = vsyncpa [#allocation4], 1 }

</bundles_post_ra>
